<compile_context>
chip_gen: v6e
topology: v6e:2x2x1
jax: 0.10.0
libtpu: 0.0.40
codegen_flags: <defaults>
</compile_context>

<pallas_src>
import jax
import jax.numpy as jnp
from jax.experimental import pallas as pl
from jax.experimental.pallas import tpu as pltpu

# ----------------------------- configuration -------------------------------
B, H, W = 2, 16, 16            # batch, image height/width
C_IN = 3                       # RGB input
MAX_DISP = 16                  # max disparity (small synthetic stand-in for 192)
H4, W4, D4 = H // 4, W // 4, MAX_DISP // 4
C_GWC = 32                     # group-wise-correlation feature channels
NUM_GROUPS = 8
GROUP_SIZE = C_GWC // NUM_GROUPS
C_UNARY = 8                    # unary (concat) feature channels
C_FEAT = C_GWC + C_UNARY
HW4 = H4 * W4                  # quarter-res positions per image  (16)
M4 = B * HW4                   # flattened quarter-res positions  (32)
N_VOL = 4                      # attention + 3 regularized cost volumes
N_CHUNK = N_VOL * B            # epilogue chunks (one per volume x batch)
HW = H * W                     # full-res positions per image     (256)


# ----------------------------- pallas helpers ------------------------------
def _full_spec(shape):
    nd = len(shape)
    return pl.BlockSpec(shape, lambda *_, nd=nd: (0,) * nd)


def _vpu_matmul(x, w):
    # (M, K) @ (K, N) as K broadcast-FMAs on the VPU (K = 3 here; MXU would idle).
    acc = x[:, 0:1] * w[0:1, :]
    for j in range(1, w.shape[0]):
        acc = acc + x[:, j:j + 1] * w[j:j + 1, :]
    return acc


def _shift_rows(x, d):
    # rolled[m, :] = x[m - d, :]   (static slices + concat; wrapped rows are
    # always masked out downstream).  pltpu.roll(x, d, axis=0) is the XLU-native
    # alternative at larger shapes.
    if d == 0:
        return x
    return jnp.roll(x, d, axis=0)


# ------------------------------- fused kernel -------------------------------
def acvnet_kernel(x_ref, wfg_ref, bfg_ref, wfu_ref, bfu_ref, gw_ref,
                  wlr_ref, ba_ref, mask_ref, ud_ref, smt_ref,
                  o_ref, c4_ref):
    f32, bf16 = jnp.float32, jnp.bfloat16
    x = x_ref[...]                                                   # (2*M4, C_IN)

    # ---- feature extraction (stand-in): shared 1x1 conv + ReLU over the
    # stacked left/right rows.  K = C_IN = 3 -> VPU FMAs, not the MXU.
    gwc_f = jnp.maximum(_vpu_matmul(x, wfg_ref[...]) + bfg_ref[...], 0.0)
    una_f = jnp.maximum(_vpu_matmul(x, wfu_ref[...]) + bfu_ref[...], 0.0)
    left_gwc, right_gwc = gwc_f[:M4, :], gwc_f[M4:, :]

    # ---- gwc attention volume via per-disparity shifted right features.
    # For each d: elementwise (lw * right[m-d]) then a one-hot MXU dot drops the
    # channel sum into lane d of the (M4, D4) slab.  No Gram, no selection masks.
    lw = left_gwc * gw_ref[...]                                      # (M4, C_GWC)
    mask = mask_ref[...]                                             # (M4, D4)
    col_id = jax.lax.broadcasted_iota(jnp.int32, (C_GWC, D4), 1)
    att = None
    for d in range(D4):                                              # D4 = 4: static unroll
        r_d = _shift_rows(right_gwc, d)
        contrib = jnp.dot((lw * r_d).astype(bf16),
                          (col_id == d).astype(bf16),
                          preferred_element_type=f32)                # (M4, D4), col d only
        att = contrib if att is None else att + contrib
    att = att * mask                                                 # zero-fill invalid d

    # ---- quarter-res softmax over disparity of the raw zero-filled volume
    # (matches F.softmax(attention_weights, dim=2) on a zero-filled cost volume).
    e = jnp.exp(att - jnp.max(att, axis=-1, keepdims=True))
    pm = e * pl.reciprocal(jnp.sum(e, axis=-1, keepdims=True), approx=True)
    pmm = pm * mask            # concat volume is zero at invalid / wrapped rows

    # ---- attention-weighted concat volume fused with the 1x1x1 aggregation
    # stand-in.  K = C_UNARY = 8 projection is ONE stacked MXU dot (frees VALU).
    proj = jnp.dot(una_f, wlr_ref[...], preferred_element_type=f32)  # (2*M4, 6)
    lproj, rproj = proj[:M4, 0:3], proj[M4:, 3:6]
    ba = ba_ref[...]                                                 # (1, 3)

    # quarter-res volumes live in a VMEM scratch, laid out (vol, b, h4*w4) x D4
    c4_ref[0:M4, :] = att                                            # volume 0: attention
    for d in range(D4):
        rp_d = _shift_rows(rproj, d)                                 # (M4, 3)
        sl = pmm[:, d:d + 1] * (lproj + rp_d) + ba                   # (M4, 3)
        for k in range(3):
            c4_ref[(k + 1) * M4:(k + 2) * M4, d:d + 1] = sl[:, k:k + 1]

    # ---- chunked epilogue: trilinear upsample + softmax over D + regression.
    # One (volume, batch) chunk per pl.loop iteration keeps cf/exp/softmax at
    # (MAX_DISP, HW) = 4 vregs each (no spills) and yields a packed (8, HW) output.
    ud = ud_ref[...]                                                 # (MAX_DISP, D4)
    smt = smt_ref[...].astype(bf16)                                  # (HW4, HW) shared
    dvals = jax.lax.broadcasted_iota(jnp.int32, (MAX_DISP, 1), 0).astype(f32)

    @pl.loop(0, N_CHUNK)
    def _(chunk):
        off = pl.multiple_of(chunk * HW4, HW4)
        slab = c4_ref[pl.ds(off, HW4), :]                            # (HW4, D4)
        dsu = jax.lax.dot_general(ud, slab, (((1,), (1,)), ((), ())),
                                  preferred_element_type=f32)        # (MAX_DISP, HW4)
        cf = jnp.dot(dsu.astype(bf16), smt,
                     preferred_element_type=f32)                     # (MAX_DISP, HW)
        ef = jnp.exp(cf - jnp.max(cf, axis=0, keepdims=True))
        p = ef * pl.reciprocal(jnp.sum(ef, axis=0, keepdims=True), approx=True)
        o_ref[pl.ds(chunk, 1), :] = jnp.sum(p * dvals, axis=0, keepdims=True)


# ------------------------------ glue / wrapper -------------------------------
def _interp_matrix(n_out, n_in):
    # 1-D linear interpolation operator matching F.interpolate(align_corners=False).
    src = (jnp.arange(n_out, dtype=jnp.float32) + 0.5) * (n_in / n_out) - 0.5
    src = jnp.clip(src, 0.0, n_in - 1.0)
    i0f = jnp.floor(src)
    frac = src - i0f
    i0 = i0f.astype(jnp.int32)
    i1 = jnp.minimum(i0 + 1, n_in - 1)
    oh0 = jax.nn.one_hot(i0, n_in, dtype=jnp.float32)
    oh1 = jax.nn.one_hot(i1, n_in, dtype=jnp.float32)
    return oh0 * (1.0 - frac)[:, None] + oh1 * frac[:, None]


def init_params(key):
    k1, k2, k3, k4, k5 = jax.random.split(key, 5)
    return {
        "w_feat": 0.2 * jax.random.normal(k1, (C_IN, C_FEAT), jnp.float32),
        "b_feat": 0.05 * jax.random.normal(k2, (1, C_FEAT), jnp.float32),
        "alpha": 1.0 + 0.1 * jax.random.normal(k3, (NUM_GROUPS,), jnp.float32),
        "w_agg": 0.3 * jax.random.normal(k4, (2 * C_UNARY, 3), jnp.float32),
        "b_agg": 0.05 * jax.random.normal(k5, (1, 3), jnp.float32),
    }


@jax.jit
def acvnet_forward(left_img, right_img, params):
    """ACVNet.forward (training=True) -> [pred_attention, disp0, disp1, disp2]."""
    # 4x4 average-pool downsample to 1/4 resolution (cheap JAX glue); stack
    # left/right rows so the shared feature conv is one batched pass.
    def pool(img):
        p = img.reshape(B, C_IN, H4, 4, W4, 4).mean(axis=(3, 5))
        return jnp.transpose(p, (0, 2, 3, 1)).reshape(M4, C_IN)

    x = jnp.concatenate([pool(left_img), pool(right_img)], axis=0)    # (2*M4, C_IN)

    # pre-split / pre-stacked weights (avoid in-kernel unaligned lane slicing)
    wf_g, wf_u = params["w_feat"][:, :C_GWC], params["w_feat"][:, C_GWC:]
    bf_g, bf_u = params["b_feat"][:, :C_GWC], params["b_feat"][:, C_GWC:]
    w_lr = jnp.concatenate([params["w_agg"][:C_UNARY, :],
                            params["w_agg"][C_UNARY:, :]], axis=1)    # (C_UNARY, 6)
    gw = jnp.repeat(params["alpha"] / GROUP_SIZE, GROUP_SIZE).reshape(1, C_GWC)

    # validity mask (w4 >= d); invalid disparity bins are zero-filled like the
    # reference's zero-filled cost volumes.
    mask = ((jnp.arange(M4)[:, None] % W4) >=
            jnp.arange(D4)[None, :]).astype(jnp.float32)              # (M4, D4)

    # trilinear upsample operators (F.interpolate, align_corners=False)
    u_d = _interp_matrix(MAX_DISP, D4)                                # (MAX_DISP, D4)
    u_h = _interp_matrix(H, H4)
    u_w = _interp_matrix(W, W4)
    smat_t = (u_h[:, None, :, None] * u_w[None, :, None, :]
              ).reshape(HW, HW4).T                                    # (HW4, HW) shared
    # TODO(synk): at real ACVNet resolution apply u_w / u_h separably instead of
    # materializing the (HW4, HW) operator.

    args = (x, wf_g, bf_g, wf_u, bf_u, gw, w_lr, params["b_agg"],
            mask, u_d, smat_t)

    out = pl.pallas_call(
        acvnet_kernel,
        out_shape=jax.ShapeDtypeStruct((N_CHUNK, HW), jnp.float32),
        grid=(1,),                     # whole toy problem fits one VMEM tile
        in_specs=[_full_spec(a.shape) for a in args],
        out_specs=_full_spec((N_CHUNK, HW)),
        scratch_shapes=[pltpu.VMEM((N_VOL * M4, D4), jnp.float32)],
        compiler_params=pltpu.CompilerParams(dimension_semantics=("arbitrary",)),
    )(*args)

    disp = out.reshape(N_VOL, B, H, W)
    return [disp[0], disp[1], disp[2], disp[3]]


if __name__ == "__main__":
    key = jax.random.PRNGKey(0)
    k_l, k_r, k_p = jax.random.split(key, 3)
    left_img = jax.random.normal(k_l, (B, C_IN, H, W), jnp.float32)
    right_img = jax.random.normal(k_r, (B, C_IN, H, W), jnp.float32)
    params = init_params(k_p)

    outputs = acvnet_forward(left_img, right_img, params)
    outputs = jax.block_until_ready(outputs)

    assert len(outputs) == 4
    for o in outputs:
        assert o.shape == (B, H, W)
        assert bool(jnp.all(jnp.isfinite(o)))
    print("KERNEL_OK")
</pallas_src>

<mosaic_0001>
module attributes {stable_mosaic.version = 11 : i64} {
  func.func @acvnet_kernel(%arg0: i32, %arg1: memref<64x3xf32, #tpu.memory_space<vmem>>, %arg2: memref<3x32xf32, #tpu.memory_space<vmem>>, %arg3: memref<1x32xf32, #tpu.memory_space<vmem>>, %arg4: memref<3x8xf32, #tpu.memory_space<vmem>>, %arg5: memref<1x8xf32, #tpu.memory_space<vmem>>, %arg6: memref<1x32xf32, #tpu.memory_space<vmem>>, %arg7: memref<8x6xf32, #tpu.memory_space<vmem>>, %arg8: memref<1x3xf32, #tpu.memory_space<vmem>>, %arg9: memref<32x4xf32, #tpu.memory_space<vmem>>, %arg10: memref<16x4xf32, #tpu.memory_space<vmem>>, %arg11: memref<16x256xf32, #tpu.memory_space<vmem>>, %arg12: memref<8x256xf32, #tpu.memory_space<vmem>>, %arg13: memref<128x4xf32, #tpu.memory_space<vmem>>) attributes {dimension_semantics = [#tpu.dimension_semantics<arbitrary>], iteration_bounds = array<i64: 1>, scalar_prefetch = 0 : i64, scratch_operands = 1 : i64, tpu.core_type = #tpu.core_type<tc>, window_params = [{pipeline_mode = #tpu.pipeline_mode<synchronous>, transform_indices = @transform_0, window_bounds = array<i64: 64, 3>}, {pipeline_mode = #tpu.pipeline_mode<synchronous>, transform_indices = @transform_1, window_bounds = array<i64: 3, 32>}, {pipeline_mode = #tpu.pipeline_mode<synchronous>, transform_indices = @transform_2, window_bounds = array<i64: 1, 32>}, {pipeline_mode = #tpu.pipeline_mode<synchronous>, transform_indices = @transform_3, window_bounds = array<i64: 3, 8>}, {pipeline_mode = #tpu.pipeline_mode<synchronous>, transform_indices = @transform_4, window_bounds = array<i64: 1, 8>}, {pipeline_mode = #tpu.pipeline_mode<synchronous>, transform_indices = @transform_5, window_bounds = array<i64: 1, 32>}, {pipeline_mode = #tpu.pipeline_mode<synchronous>, transform_indices = @transform_6, window_bounds = array<i64: 8, 6>}, {pipeline_mode = #tpu.pipeline_mode<synchronous>, transform_indices = @transform_7, window_bounds = array<i64: 1, 3>}, {pipeline_mode = #tpu.pipeline_mode<synchronous>, transform_indices = @transform_8, window_bounds = array<i64: 32, 4>}, {pipeline_mode = #tpu.pipeline_mode<synchronous>, transform_indices = @transform_9, window_bounds = array<i64: 16, 4>}, {pipeline_mode = #tpu.pipeline_mode<synchronous>, transform_indices = @transform_10, window_bounds = array<i64: 16, 256>}, {pipeline_mode = #tpu.pipeline_mode<synchronous>, transform_indices = @transform_11, window_bounds = array<i64: 8, 256>}]} {
    %c0 = arith.constant 0 : index
    %c0_0 = arith.constant 0 : index
    %0 = vector.load %arg1[%c0, %c0_0] : memref<64x3xf32, #tpu.memory_space<vmem>>, vector<64x3xf32>
    %c0_1 = arith.constant 0 : index
    %c0_2 = arith.constant 0 : index
    %1 = vector.load %arg2[%c0_1, %c0_2] : memref<3x32xf32, #tpu.memory_space<vmem>>, vector<3x32xf32>
    %2 = vector.extract_strided_slice %0 {offsets = [0, 0], sizes = [64, 1], strides = [1, 1]} : vector<64x3xf32> to vector<64x1xf32>
    %3 = vector.extract_strided_slice %1 {offsets = [0, 0], sizes = [1, 32], strides = [1, 1]} : vector<3x32xf32> to vector<1x32xf32>
    %4 = vector.broadcast %2 : vector<64x1xf32> to vector<64x32xf32>
    %5 = vector.broadcast %3 : vector<1x32xf32> to vector<64x32xf32>
    %6 = arith.mulf %4, %5 : vector<64x32xf32>
    %7 = vector.extract_strided_slice %0 {offsets = [0, 1], sizes = [64, 1], strides = [1, 1]} : vector<64x3xf32> to vector<64x1xf32>
    %8 = vector.extract_strided_slice %1 {offsets = [1, 0], sizes = [1, 32], strides = [1, 1]} : vector<3x32xf32> to vector<1x32xf32>
    %9 = vector.broadcast %7 : vector<64x1xf32> to vector<64x32xf32>
    %10 = vector.broadcast %8 : vector<1x32xf32> to vector<64x32xf32>
    %11 = arith.mulf %9, %10 : vector<64x32xf32>
    %12 = arith.addf %6, %11 : vector<64x32xf32>
    %13 = vector.extract_strided_slice %0 {offsets = [0, 2], sizes = [64, 1], strides = [1, 1]} : vector<64x3xf32> to vector<64x1xf32>
    %14 = vector.extract_strided_slice %1 {offsets = [2, 0], sizes = [1, 32], strides = [1, 1]} : vector<3x32xf32> to vector<1x32xf32>
    %15 = vector.broadcast %13 : vector<64x1xf32> to vector<64x32xf32>
    %16 = vector.broadcast %14 : vector<1x32xf32> to vector<64x32xf32>
    %17 = arith.mulf %15, %16 : vector<64x32xf32>
    %18 = arith.addf %12, %17 : vector<64x32xf32>
    %c0_3 = arith.constant 0 : index
    %c0_4 = arith.constant 0 : index
    %19 = vector.load %arg3[%c0_3, %c0_4] : memref<1x32xf32, #tpu.memory_space<vmem>>, vector<1x32xf32>
    %20 = vector.broadcast %19 : vector<1x32xf32> to vector<64x32xf32>
    %21 = arith.addf %18, %20 : vector<64x32xf32>
    %cst = arith.constant 0.000000e+00 : f32
    %22 = vector.broadcast %cst : f32 to vector<64x32xf32>
    %23 = arith.maximumf %21, %22 : vector<64x32xf32>
    %c0_5 = arith.constant 0 : index
    %c0_6 = arith.constant 0 : index
    %24 = vector.load %arg4[%c0_5, %c0_6] : memref<3x8xf32, #tpu.memory_space<vmem>>, vector<3x8xf32>
    %25 = vector.extract_strided_slice %0 {offsets = [0, 0], sizes = [64, 1], strides = [1, 1]} : vector<64x3xf32> to vector<64x1xf32>
    %26 = vector.extract_strided_slice %24 {offsets = [0, 0], sizes = [1, 8], strides = [1, 1]} : vector<3x8xf32> to vector<1x8xf32>
    %27 = vector.broadcast %25 : vector<64x1xf32> to vector<64x8xf32>
    %28 = vector.broadcast %26 : vector<1x8xf32> to vector<64x8xf32>
    %29 = arith.mulf %27, %28 : vector<64x8xf32>
    %30 = vector.extract_strided_slice %0 {offsets = [0, 1], sizes = [64, 1], strides = [1, 1]} : vector<64x3xf32> to vector<64x1xf32>
    %31 = vector.extract_strided_slice %24 {offsets = [1, 0], sizes = [1, 8], strides = [1, 1]} : vector<3x8xf32> to vector<1x8xf32>
    %32 = vector.broadcast %30 : vector<64x1xf32> to vector<64x8xf32>
    %33 = vector.broadcast %31 : vector<1x8xf32> to vector<64x8xf32>
    %34 = arith.mulf %32, %33 : vector<64x8xf32>
    %35 = arith.addf %29, %34 : vector<64x8xf32>
    %36 = vector.extract_strided_slice %0 {offsets = [0, 2], sizes = [64, 1], strides = [1, 1]} : vector<64x3xf32> to vector<64x1xf32>
    %37 = vector.extract_strided_slice %24 {offsets = [2, 0], sizes = [1, 8], strides = [1, 1]} : vector<3x8xf32> to vector<1x8xf32>
    %38 = vector.broadcast %36 : vector<64x1xf32> to vector<64x8xf32>
    %39 = vector.broadcast %37 : vector<1x8xf32> to vector<64x8xf32>
    %40 = arith.mulf %38, %39 : vector<64x8xf32>
    %41 = arith.addf %35, %40 : vector<64x8xf32>
    %c0_7 = arith.constant 0 : index
    %c0_8 = arith.constant 0 : index
    %42 = vector.load %arg5[%c0_7, %c0_8] : memref<1x8xf32, #tpu.memory_space<vmem>>, vector<1x8xf32>
    %43 = vector.broadcast %42 : vector<1x8xf32> to vector<64x8xf32>
    %44 = arith.addf %41, %43 : vector<64x8xf32>
    %cst_9 = arith.constant 0.000000e+00 : f32
    %45 = vector.broadcast %cst_9 : f32 to vector<64x8xf32>
    %46 = arith.maximumf %44, %45 : vector<64x8xf32>
    %47 = vector.extract_strided_slice %23 {offsets = [0, 0], sizes = [32, 32], strides = [1, 1]} : vector<64x32xf32> to vector<32x32xf32>
    %48 = vector.extract_strided_slice %23 {offsets = [32, 0], sizes = [32, 32], strides = [1, 1]} : vector<64x32xf32> to vector<32x32xf32>
    %c0_10 = arith.constant 0 : index
    %c0_11 = arith.constant 0 : index
    %49 = vector.load %arg6[%c0_10, %c0_11] : memref<1x32xf32, #tpu.memory_space<vmem>>, vector<1x32xf32>
    %50 = vector.broadcast %49 : vector<1x32xf32> to vector<32x32xf32>
    %51 = arith.mulf %47, %50 : vector<32x32xf32>
    %c0_12 = arith.constant 0 : index
    %c0_13 = arith.constant 0 : index
    %52 = vector.load %arg9[%c0_12, %c0_13] : memref<32x4xf32, #tpu.memory_space<vmem>>, vector<32x4xf32>
    %53 = tpu.iota {dimensions = array<i32: 1>} : vector<32x4xi32>
    %54 = arith.mulf %51, %48 : vector<32x32xf32>
    %55 = arith.truncf %54 : vector<32x32xf32> to vector<32x32xbf16>
    %c0_i32 = arith.constant 0 : i32
    %56 = vector.broadcast %c0_i32 : i32 to vector<32x4xi32>
    %57 = arith.cmpi eq, %53, %56 : vector<32x4xi32>
    %58 = arith.extui %57 : vector<32x4xi1> to vector<32x4xi32>
    %59 = arith.sitofp %58 : vector<32x4xi32> to vector<32x4xf32>
    %60 = arith.truncf %59 : vector<32x4xf32> to vector<32x4xbf16>
    %cst_14 = arith.constant dense<0.000000e+00> : vector<32x4xf32>
    %61 = tpu.matmul %55, %60, %cst_14 {dimension_numbers = #tpu.dot_dimension_numbers<[1], [0], [0], [1], [0, 0, 1, 1], [], []>} : vector<32x32xbf16>, vector<32x4xbf16>, vector<32x4xf32> -> vector<32x4xf32>
    %62 = vector.extract_strided_slice %48 {offsets = [31, 0], sizes = [1, 32], strides = [1, 1]} : vector<32x32xf32> to vector<1x32xf32>
    %63 = vector.extract_strided_slice %48 {offsets = [0, 0], sizes = [31, 32], strides = [1, 1]} : vector<32x32xf32> to vector<31x32xf32>
    %64 = tpu.concatenate %62, %63 in 0 : vector<1x32xf32>, vector<31x32xf32> -> vector<32x32xf32>
    %65 = arith.mulf %51, %64 : vector<32x32xf32>
    %66 = arith.truncf %65 : vector<32x32xf32> to vector<32x32xbf16>
    %c1_i32 = arith.constant 1 : i32
    %67 = vector.broadcast %c1_i32 : i32 to vector<32x4xi32>
    %68 = arith.cmpi eq, %53, %67 : vector<32x4xi32>
    %69 = arith.extui %68 : vector<32x4xi1> to vector<32x4xi32>
    %70 = arith.sitofp %69 : vector<32x4xi32> to vector<32x4xf32>
    %71 = arith.truncf %70 : vector<32x4xf32> to vector<32x4xbf16>
    %cst_15 = arith.constant dense<0.000000e+00> : vector<32x4xf32>
    %72 = tpu.matmul %66, %71, %cst_15 {dimension_numbers = #tpu.dot_dimension_numbers<[1], [0], [0], [1], [0, 0, 1, 1], [], []>} : vector<32x32xbf16>, vector<32x4xbf16>, vector<32x4xf32> -> vector<32x4xf32>
    %73 = arith.addf %61, %72 : vector<32x4xf32>
    %74 = vector.extract_strided_slice %48 {offsets = [30, 0], sizes = [2, 32], strides = [1, 1]} : vector<32x32xf32> to vector<2x32xf32>
    %75 = vector.extract_strided_slice %48 {offsets = [0, 0], sizes = [30, 32], strides = [1, 1]} : vector<32x32xf32> to vector<30x32xf32>
    %76 = tpu.concatenate %74, %75 in 0 : vector<2x32xf32>, vector<30x32xf32> -> vector<32x32xf32>
    %77 = arith.mulf %51, %76 : vector<32x32xf32>
    %78 = arith.truncf %77 : vector<32x32xf32> to vector<32x32xbf16>
    %c2_i32 = arith.constant 2 : i32
    %79 = vector.broadcast %c2_i32 : i32 to vector<32x4xi32>
    %80 = arith.cmpi eq, %53, %79 : vector<32x4xi32>
    %81 = arith.extui %80 : vector<32x4xi1> to vector<32x4xi32>
    %82 = arith.sitofp %81 : vector<32x4xi32> to vector<32x4xf32>
    %83 = arith.truncf %82 : vector<32x4xf32> to vector<32x4xbf16>
    %cst_16 = arith.constant dense<0.000000e+00> : vector<32x4xf32>
    %84 = tpu.matmul %78, %83, %cst_16 {dimension_numbers = #tpu.dot_dimension_numbers<[1], [0], [0], [1], [0, 0, 1, 1], [], []>} : vector<32x32xbf16>, vector<32x4xbf16>, vector<32x4xf32> -> vector<32x4xf32>
    %85 = arith.addf %73, %84 : vector<32x4xf32>
    %86 = vector.extract_strided_slice %48 {offsets = [29, 0], sizes = [3, 32], strides = [1, 1]} : vector<32x32xf32> to vector<3x32xf32>
    %87 = vector.extract_strided_slice %48 {offsets = [0, 0], sizes = [29, 32], strides = [1, 1]} : vector<32x32xf32> to vector<29x32xf32>
    %88 = tpu.concatenate %86, %87 in 0 : vector<3x32xf32>, vector<29x32xf32> -> vector<32x32xf32>
    %89 = arith.mulf %51, %88 : vector<32x32xf32>
    %90 = arith.truncf %89 : vector<32x32xf32> to vector<32x32xbf16>
    %c3_i32 = arith.constant 3 : i32
    %91 = vector.broadcast %c3_i32 : i32 to vector<32x4xi32>
    %92 = arith.cmpi eq, %53, %91 : vector<32x4xi32>
    %93 = arith.extui %92 : vector<32x4xi1> to vector<32x4xi32>
    %94 = arith.sitofp %93 : vector<32x4xi32> to vector<32x4xf32>
    %95 = arith.truncf %94 : vector<32x4xf32> to vector<32x4xbf16>
    %cst_17 = arith.constant dense<0.000000e+00> : vector<32x4xf32>
    %96 = tpu.matmul %90, %95, %cst_17 {dimension_numbers = #tpu.dot_dimension_numbers<[1], [0], [0], [1], [0, 0, 1, 1], [], []>} : vector<32x32xbf16>, vector<32x4xbf16>, vector<32x4xf32> -> vector<32x4xf32>
    %97 = arith.addf %85, %96 : vector<32x4xf32>
    %98 = arith.mulf %97, %52 : vector<32x4xf32>
    %cst_18 = arith.constant dense<0xFF800000> : vector<32xf32>
    %99 = vector.multi_reduction <maximumf>, %98, %cst_18 [1] : vector<32x4xf32> to vector<32xf32>
    %100 = vector.shape_cast %99 : vector<32xf32> to vector<32x1xf32>
    %101 = vector.broadcast %100 : vector<32x1xf32> to vector<32x4xf32>
    %102 = arith.subf %98, %101 : vector<32x4xf32>
    %103 = math.exp %102 : vector<32x4xf32>
    %cst_19 = arith.constant dense<0.000000e+00> : vector<32xf32>
    %104 = vector.multi_reduction <add>, %103, %cst_19 [1] : vector<32x4xf32> to vector<32xf32>
    %105 = vector.shape_cast %104 : vector<32xf32> to vector<32x1xf32>
    %106 = tpu.reciprocal %105 {approx = true} : vector<32x1xf32> -> vector<32x1xf32>
    %107 = vector.broadcast %106 : vector<32x1xf32> to vector<32x4xf32>
    %108 = arith.mulf %103, %107 : vector<32x4xf32>
    %109 = arith.mulf %108, %52 : vector<32x4xf32>
    %c0_20 = arith.constant 0 : index
    %c0_21 = arith.constant 0 : index
    %110 = vector.load %arg7[%c0_20, %c0_21] : memref<8x6xf32, #tpu.memory_space<vmem>>, vector<8x6xf32>
    %cst_22 = arith.constant dense<0.000000e+00> : vector<64x6xf32>
    %111 = tpu.matmul %46, %110, %cst_22 {dimension_numbers = #tpu.dot_dimension_numbers<[1], [0], [0], [1], [0, 0, 1, 1], [], []>} : vector<64x8xf32>, vector<8x6xf32>, vector<64x6xf32> -> vector<64x6xf32>
    %112 = vector.extract_strided_slice %111 {offsets = [0, 0], sizes = [32, 3], strides = [1, 1]} : vector<64x6xf32> to vector<32x3xf32>
    %113 = vector.extract_strided_slice %111 {offsets = [32, 3], sizes = [32, 3], strides = [1, 1]} : vector<64x6xf32> to vector<32x3xf32>
    %c0_23 = arith.constant 0 : index
    %c0_24 = arith.constant 0 : index
    %114 = vector.load %arg8[%c0_23, %c0_24] : memref<1x3xf32, #tpu.memory_space<vmem>>, vector<1x3xf32>
    %c0_25 = arith.constant 0 : index
    %c0_26 = arith.constant 0 : index
    %115 = vector.load %arg13[%c0_25, %c0_26] : memref<128x4xf32, #tpu.memory_space<vmem>>, vector<32x4xf32>
    tpu.vector_store %arg13[%c0_25, %c0_26], %98 {strides = array<i32>} : memref<128x4xf32, #tpu.memory_space<vmem>>, vector<32x4xf32>,
    %116 = vector.extract_strided_slice %109 {offsets = [0, 0], sizes = [32, 1], strides = [1, 1]} : vector<32x4xf32> to vector<32x1xf32>
    %117 = arith.addf %112, %113 : vector<32x3xf32>
    %118 = vector.broadcast %116 : vector<32x1xf32> to vector<32x3xf32>
    %119 = arith.mulf %118, %117 : vector<32x3xf32>
    %120 = vector.broadcast %114 : vector<1x3xf32> to vector<32x3xf32>
    %121 = arith.addf %119, %120 : vector<32x3xf32>
    %122 = vector.extract_strided_slice %121 {offsets = [0, 0], sizes = [32, 1], strides = [1, 1]} : vector<32x3xf32> to vector<32x1xf32>
    %c32 = arith.constant 32 : index
    %c0_27 = arith.constant 0 : index
    %123 = vector.load %arg13[%c32, %c0_27] : memref<128x4xf32, #tpu.memory_space<vmem>>, vector<32x1xf32>
    tpu.vector_store %arg13[%c32, %c0_27], %122 {strides = array<i32>} : memref<128x4xf32, #tpu.memory_space<vmem>>, vector<32x1xf32>,
    %124 = vector.extract_strided_slice %121 {offsets = [0, 1], sizes = [32, 1], strides = [1, 1]} : vector<32x3xf32> to vector<32x1xf32>
    %c64 = arith.constant 64 : index
    %c0_28 = arith.constant 0 : index
    %125 = vector.load %arg13[%c64, %c0_28] : memref<128x4xf32, #tpu.memory_space<vmem>>, vector<32x1xf32>
    tpu.vector_store %arg13[%c64, %c0_28], %124 {strides = array<i32>} : memref<128x4xf32, #tpu.memory_space<vmem>>, vector<32x1xf32>,
    %126 = vector.extract_strided_slice %121 {offsets = [0, 2], sizes = [32, 1], strides = [1, 1]} : vector<32x3xf32> to vector<32x1xf32>
    %c96 = arith.constant 96 : index
    %c0_29 = arith.constant 0 : index
    %127 = vector.load %arg13[%c96, %c0_29] : memref<128x4xf32, #tpu.memory_space<vmem>>, vector<32x1xf32>
    tpu.vector_store %arg13[%c96, %c0_29], %126 {strides = array<i32>} : memref<128x4xf32, #tpu.memory_space<vmem>>, vector<32x1xf32>,
    %128 = vector.extract_strided_slice %113 {offsets = [31, 0], sizes = [1, 3], strides = [1, 1]} : vector<32x3xf32> to vector<1x3xf32>
    %129 = vector.extract_strided_slice %113 {offsets = [0, 0], sizes = [31, 3], strides = [1, 1]} : vector<32x3xf32> to vector<31x3xf32>
    %130 = tpu.concatenate %128, %129 in 0 : vector<1x3xf32>, vector<31x3xf32> -> vector<32x3xf32>
    %131 = vector.extract_strided_slice %109 {offsets = [0, 1], sizes = [32, 1], strides = [1, 1]} : vector<32x4xf32> to vector<32x1xf32>
    %132 = arith.addf %112, %130 : vector<32x3xf32>
    %133 = vector.broadcast %131 : vector<32x1xf32> to vector<32x3xf32>
    %134 = arith.mulf %133, %132 : vector<32x3xf32>
    %135 = vector.broadcast %114 : vector<1x3xf32> to vector<32x3xf32>
    %136 = arith.addf %134, %135 : vector<32x3xf32>
    %137 = vector.extract_strided_slice %136 {offsets = [0, 0], sizes = [32, 1], strides = [1, 1]} : vector<32x3xf32> to vector<32x1xf32>
    %c32_30 = arith.constant 32 : index
    %c1 = arith.constant 1 : index
    %138 = vector.load %arg13[%c32_30, %c1] : memref<128x4xf32, #tpu.memory_space<vmem>>, vector<32x1xf32>
    tpu.vector_store %arg13[%c32_30, %c1], %137 {strides = array<i32>} : memref<128x4xf32, #tpu.memory_space<vmem>>, vector<32x1xf32>,
    %139 = vector.extract_strided_slice %136 {offsets = [0, 1], sizes = [32, 1], strides = [1, 1]} : vector<32x3xf32> to vector<32x1xf32>
    %c64_31 = arith.constant 64 : index
    %c1_32 = arith.constant 1 : index
    %140 = vector.load %arg13[%c64_31, %c1_32] : memref<128x4xf32, #tpu.memory_space<vmem>>, vector<32x1xf32>
    tpu.vector_store %arg13[%c64_31, %c1_32], %139 {strides = array<i32>} : memref<128x4xf32, #tpu.memory_space<vmem>>, vector<32x1xf32>,
    %141 = vector.extract_strided_slice %136 {offsets = [0, 2], sizes = [32, 1], strides = [1, 1]} : vector<32x3xf32> to vector<32x1xf32>
    %c96_33 = arith.constant 96 : index
    %c1_34 = arith.constant 1 : index
    %142 = vector.load %arg13[%c96_33, %c1_34] : memref<128x4xf32, #tpu.memory_space<vmem>>, vector<32x1xf32>
    tpu.vector_store %arg13[%c96_33, %c1_34], %141 {strides = array<i32>} : memref<128x4xf32, #tpu.memory_space<vmem>>, vector<32x1xf32>,
    %143 = vector.extract_strided_slice %113 {offsets = [30, 0], sizes = [2, 3], strides = [1, 1]} : vector<32x3xf32> to vector<2x3xf32>
    %144 = vector.extract_strided_slice %113 {offsets = [0, 0], sizes = [30, 3], strides = [1, 1]} : vector<32x3xf32> to vector<30x3xf32>
    %145 = tpu.concatenate %143, %144 in 0 : vector<2x3xf32>, vector<30x3xf32> -> vector<32x3xf32>
    %146 = vector.extract_strided_slice %109 {offsets = [0, 2], sizes = [32, 1], strides = [1, 1]} : vector<32x4xf32> to vector<32x1xf32>
    %147 = arith.addf %112, %145 : vector<32x3xf32>
    %148 = vector.broadcast %146 : vector<32x1xf32> to vector<32x3xf32>
    %149 = arith.mulf %148, %147 : vector<32x3xf32>
    %150 = vector.broadcast %114 : vector<1x3xf32> to vector<32x3xf32>
    %151 = arith.addf %149, %150 : vector<32x3xf32>
    %152 = vector.extract_strided_slice %151 {offsets = [0, 0], sizes = [32, 1], strides = [1, 1]} : vector<32x3xf32> to vector<32x1xf32>
    %c32_35 = arith.constant 32 : index
    %c2 = arith.constant 2 : index
    %153 = vector.load %arg13[%c32_35, %c2] : memref<128x4xf32, #tpu.memory_space<vmem>>, vector<32x1xf32>
    tpu.vector_store %arg13[%c32_35, %c2], %152 {strides = array<i32>} : memref<128x4xf32, #tpu.memory_space<vmem>>, vector<32x1xf32>,
    %154 = vector.extract_strided_slice %151 {offsets = [0, 1], sizes = [32, 1], strides = [1, 1]} : vector<32x3xf32> to vector<32x1xf32>
    %c64_36 = arith.constant 64 : index
    %c2_37 = arith.constant 2 : index
    %155 = vector.load %arg13[%c64_36, %c2_37] : memref<128x4xf32, #tpu.memory_space<vmem>>, vector<32x1xf32>
    tpu.vector_store %arg13[%c64_36, %c2_37], %154 {strides = array<i32>} : memref<128x4xf32, #tpu.memory_space<vmem>>, vector<32x1xf32>,
    %156 = vector.extract_strided_slice %151 {offsets = [0, 2], sizes = [32, 1], strides = [1, 1]} : vector<32x3xf32> to vector<32x1xf32>
    %c96_38 = arith.constant 96 : index
    %c2_39 = arith.constant 2 : index
    %157 = vector.load %arg13[%c96_38, %c2_39] : memref<128x4xf32, #tpu.memory_space<vmem>>, vector<32x1xf32>
    tpu.vector_store %arg13[%c96_38, %c2_39], %156 {strides = array<i32>} : memref<128x4xf32, #tpu.memory_space<vmem>>, vector<32x1xf32>,
    %158 = vector.extract_strided_slice %113 {offsets = [29, 0], sizes = [3, 3], strides = [1, 1]} : vector<32x3xf32> to vector<3x3xf32>
    %159 = vector.extract_strided_slice %113 {offsets = [0, 0], sizes = [29, 3], strides = [1, 1]} : vector<32x3xf32> to vector<29x3xf32>
    %160 = tpu.concatenate %158, %159 in 0 : vector<3x3xf32>, vector<29x3xf32> -> vector<32x3xf32>
    %161 = vector.extract_strided_slice %109 {offsets = [0, 3], sizes = [32, 1], strides = [1, 1]} : vector<32x4xf32> to vector<32x1xf32>
    %162 = arith.addf %112, %160 : vector<32x3xf32>
    %163 = vector.broadcast %161 : vector<32x1xf32> to vector<32x3xf32>
    %164 = arith.mulf %163, %162 : vector<32x3xf32>
    %165 = vector.broadcast %114 : vector<1x3xf32> to vector<32x3xf32>
    %166 = arith.addf %164, %165 : vector<32x3xf32>
    %167 = vector.extract_strided_slice %166 {offsets = [0, 0], sizes = [32, 1], strides = [1, 1]} : vector<32x3xf32> to vector<32x1xf32>
    %c32_40 = arith.constant 32 : index
    %c3 = arith.constant 3 : index
    %168 = vector.load %arg13[%c32_40, %c3] : memref<128x4xf32, #tpu.memory_space<vmem>>, vector<32x1xf32>
    tpu.vector_store %arg13[%c32_40, %c3], %167 {strides = array<i32>} : memref<128x4xf32, #tpu.memory_space<vmem>>, vector<32x1xf32>,
    %169 = vector.extract_strided_slice %166 {offsets = [0, 1], sizes = [32, 1], strides = [1, 1]} : vector<32x3xf32> to vector<32x1xf32>
    %c64_41 = arith.constant 64 : index
    %c3_42 = arith.constant 3 : index
    %170 = vector.load %arg13[%c64_41, %c3_42] : memref<128x4xf32, #tpu.memory_space<vmem>>, vector<32x1xf32>
    tpu.vector_store %arg13[%c64_41, %c3_42], %169 {strides = array<i32>} : memref<128x4xf32, #tpu.memory_space<vmem>>, vector<32x1xf32>,
    %171 = vector.extract_strided_slice %166 {offsets = [0, 2], sizes = [32, 1], strides = [1, 1]} : vector<32x3xf32> to vector<32x1xf32>
    %c96_43 = arith.constant 96 : index
    %c3_44 = arith.constant 3 : index
    %172 = vector.load %arg13[%c96_43, %c3_44] : memref<128x4xf32, #tpu.memory_space<vmem>>, vector<32x1xf32>
    tpu.vector_store %arg13[%c96_43, %c3_44], %171 {strides = array<i32>} : memref<128x4xf32, #tpu.memory_space<vmem>>, vector<32x1xf32>,
    %c0_45 = arith.constant 0 : index
    %c0_46 = arith.constant 0 : index
    %173 = vector.load %arg10[%c0_45, %c0_46] : memref<16x4xf32, #tpu.memory_space<vmem>>, vector<16x4xf32>
    %c0_47 = arith.constant 0 : index
    %c0_48 = arith.constant 0 : index
    %174 = vector.load %arg11[%c0_47, %c0_48] : memref<16x256xf32, #tpu.memory_space<vmem>>, vector<16x256xf32>
    %175 = arith.truncf %174 : vector<16x256xf32> to vector<16x256xbf16>
    %176 = tpu.iota {dimensions = array<i32: 0>} : vector<16x1xi32>
    %177 = arith.sitofp %176 : vector<16x1xi32> to vector<16x1xf32>
    %c0_i32_49 = arith.constant 0 : i32
    %c8_i32 = arith.constant 8 : i32
    %178 = arith.addi %c0_i32_49, %c8_i32 : i32
    %c1_i32_50 = arith.constant 1 : i32
    scf.for %arg14 = %c0_i32_49 to %178 step %c1_i32_50  : i32 {
      %c1_i32_52 = arith.constant 1 : i32
      %179 = arith.muli %arg14, %c1_i32_52 : i32
      %c0_i32_53 = arith.constant 0 : i32
      %180 = arith.addi %c0_i32_53, %179 : i32
      %c16_i32 = arith.constant 16 : i32
      %181 = arith.muli %180, %c16_i32 : i32
      %182 = tpu.assume_multiple %181, 16 : i32
      %183 = arith.index_cast %182 : i32 to index
      %c0_54 = arith.constant 0 : index
      %184 = vector.load %arg13[%183, %c0_54] : memref<128x4xf32, #tpu.memory_space<vmem>>, vector<16x4xf32>
      %cst_55 = arith.constant dense<0.000000e+00> : vector<16x16xf32>
      %185 = tpu.matmul %173, %184, %cst_55 {dimension_numbers = #tpu.dot_dimension_numbers<[1], [1], [0], [0], [0, 0, 1, 0], [], []>} : vector<16x4xf32>, vector<16x4xf32>, vector<16x16xf32> -> vector<16x16xf32>
      %186 = arith.truncf %185 : vector<16x16xf32> to vector<16x16xbf16>
      %cst_56 = arith.constant dense<0.000000e+00> : vector<16x256xf32>
      %187 = tpu.matmul %186, %175, %cst_56 {dimension_numbers = #tpu.dot_dimension_numbers<[1], [0], [0], [1], [0, 0, 1, 1], [], []>} : vector<16x16xbf16>, vector<16x256xbf16>, vector<16x256xf32> -> vector<16x256xf32>
      %cst_57 = arith.constant dense<0xFF800000> : vector<256xf32>
      %188 = vector.multi_reduction <maximumf>, %187, %cst_57 [0] : vector<16x256xf32> to vector<256xf32>
      %189 = vector.shape_cast %188 : vector<256xf32> to vector<1x256xf32>
      %190 = vector.broadcast %189 : vector<1x256xf32> to vector<16x256xf32>
      %191 = arith.subf %187, %190 : vector<16x256xf32>
      %192 = math.exp %191 : vector<16x256xf32>
      %cst_58 = arith.constant dense<0.000000e+00> : vector<256xf32>
      %193 = vector.multi_reduction <add>, %192, %cst_58 [0] : vector<16x256xf32> to vector<256xf32>
      %194 = vector.shape_cast %193 : vector<256xf32> to vector<1x256xf32>
      %195 = tpu.reciprocal %194 {approx = true} : vector<1x256xf32> -> vector<1x256xf32>
      %196 = vector.broadcast %195 : vector<1x256xf32> to vector<16x256xf32>
      %197 = arith.mulf %192, %196 : vector<16x256xf32>
      %198 = vector.broadcast %177 : vector<16x1xf32> to vector<16x256xf32>
      %199 = arith.mulf %197, %198 : vector<16x256xf32>
      %cst_59 = arith.constant dense<0.000000e+00> : vector<256xf32>
      %200 = vector.multi_reduction <add>, %199, %cst_59 [0] : vector<16x256xf32> to vector<256xf32>
      %201 = vector.shape_cast %200 : vector<256xf32> to vector<1x256xf32>
      %202 = arith.index_cast %180 : i32 to index
      %c0_60 = arith.constant 0 : index
      %203 = vector.load %arg12[%202, %c0_60] : memref<8x256xf32, #tpu.memory_space<vmem>>, vector<1x256xf32>
      tpu.vector_store %arg12[%202, %c0_60], %201 {strides = array<i32>} : memref<8x256xf32, #tpu.memory_space<vmem>>, vector<1x256xf32>,
    }
    %c8_i32_51 = arith.constant 8 : i32
    return
  }
  func.func @transform_0(%arg0: i32) -> (i32, i32) {
    %c0_i32 = arith.constant 0 : i32
    %c0_i32_0 = arith.constant 0 : i32
    %c0_i32_1 = arith.constant 0 : i32
    return %c0_i32, %c0_i32_0 : i32, i32
  }
  func.func @transform_1(%arg0: i32) -> (i32, i32) {
    %c0_i32 = arith.constant 0 : i32
    %c0_i32_0 = arith.constant 0 : i32
    %c0_i32_1 = arith.constant 0 : i32
    return %c0_i32, %c0_i32_0 : i32, i32
  }
  func.func @transform_2(%arg0: i32) -> (i32, i32) {
    %c0_i32 = arith.constant 0 : i32
    %c0_i32_0 = arith.constant 0 : i32
    %c0_i32_1 = arith.constant 0 : i32
    return %c0_i32, %c0_i32_0 : i32, i32
  }
  func.func @transform_3(%arg0: i32) -> (i32, i32) {
    %c0_i32 = arith.constant 0 : i32
    %c0_i32_0 = arith.constant 0 : i32
    %c0_i32_1 = arith.constant 0 : i32
    return %c0_i32, %c0_i32_0 : i32, i32
  }
  func.func @transform_4(%arg0: i32) -> (i32, i32) {
    %c0_i32 = arith.constant 0 : i32
    %c0_i32_0 = arith.constant 0 : i32
    %c0_i32_1 = arith.constant 0 : i32
    return %c0_i32, %c0_i32_0 : i32, i32
  }
  func.func @transform_5(%arg0: i32) -> (i32, i32) {
    %c0_i32 = arith.constant 0 : i32
    %c0_i32_0 = arith.constant 0 : i32
    %c0_i32_1 = arith.constant 0 : i32
    return %c0_i32, %c0_i32_0 : i32, i32
  }
  func.func @transform_6(%arg0: i32) -> (i32, i32) {
    %c0_i32 = arith.constant 0 : i32
    %c0_i32_0 = arith.constant 0 : i32
    %c0_i32_1 = arith.constant 0 : i32
    return %c0_i32, %c0_i32_0 : i32, i32
  }
  func.func @transform_7(%arg0: i32) -> (i32, i32) {
    %c0_i32 = arith.constant 0 : i32
    %c0_i32_0 = arith.constant 0 : i32
    %c0_i32_1 = arith.constant 0 : i32
    return %c0_i32, %c0_i32_0 : i32, i32
  }
  func.func @transform_8(%arg0: i32) -> (i32, i32) {
    %c0_i32 = arith.constant 0 : i32
    %c0_i32_0 = arith.constant 0 : i32
    %c0_i32_1 = arith.constant 0 : i32
    return %c0_i32, %c0_i32_0 : i32, i32
  }
  func.func @transform_9(%arg0: i32) -> (i32, i32) {
    %c0_i32 = arith.constant 0 : i32
    %c0_i32_0 = arith.constant 0 : i32
    %c0_i32_1 = arith.constant 0 : i32
    return %c0_i32, %c0_i32_0 : i32, i32
  }
  func.func @transform_10(%arg0: i32) -> (i32, i32) {
    %c0_i32 = arith.constant 0 : i32
    %c0_i32_0 = arith.constant 0 : i32
    %c0_i32_1 = arith.constant 0 : i32
    return %c0_i32, %c0_i32_0 : i32, i32
  }
  func.func @transform_11(%arg0: i32) -> (i32, i32) {
    %c0_i32 = arith.constant 0 : i32
    %c0_i32_0 = arith.constant 0 : i32
    %c0_i32_1 = arith.constant 0 : i32
    return %c0_i32, %c0_i32_0 : i32, i32
  }
}

</mosaic_0001>

<bundles_post_ra>
// kernel: squeeze.4
= control target key start
LH: loop header
LB: loop body
LE: loop exit
PB: predicated region body
PF: predicated region fallthrough
CT: control target
= control target key end

     0   :  { %s139_s0 = inlined_call_operand.vmem [shape: f32[2,256], index: 0, kind: input, shape index: {}]   ;;  %s140_s1 = inlined_call_operand.hbm [shape: f32[2,16,16], index: 1, kind: output, shape index: {}]  }
   0x1   :  { %v72_v0 = vld [vmem:[%s139_s0 + $0x2] sm:$0x3]  ;;  %v10_v1 = vld [vmem:[%s139_s0] sm:$0x3] }
   0x2   :  { %9 = vst [vmem:[#allocation2 + $0x8] sm:$0x3] %v72_v0  ;;  %11 = vst [vmem:[#allocation2] sm:$0x3] %v10_v1 }
   0x3   :  { %2 = vsyncpa [#allocation1], 0  ;;  %vm13_vm0 = vcmask 130048   ;;  %s103_s0 = smov 112   ;;  %s104_s10 = smov 80  }
   0x4   :  { %s105_s11 = smov 96   ;;  %s106_s12 = smov 64  }
   0x5   :  { %s107_s13 = smov 48   ;;  %s108_s14 = smov 32  }
   0x6   :  { %s109_s15 = smov 16   ;;  %s110_s16 = smov [#allocation0]  }
   0x7   :  { %s66_s17 = sshll.u32 %s110_s16, 4  ;;  %s67_s17 = int_to_ptr.vmem [resolvable:$true] %s66_s17 }
   0x8   :  { %s81_s18 = scalar_lea.vmem %s67_s17, 512  ;;  %p86_p1 = scmp.lt.s32.totalorder %s67_s17, %s67_s17 }
   0x9   :  { %v20_v2 = vld.sshfl [vmem:[#allocation2] sm:$0xff pattern:$0x99999180]   ;;  %p82_p0 = scmp.ne.s32.totalorder %s67_s17, %s81_s18  ;;  %p87_p2 = scmp.lt.s32.totalorder %s81_s18, %s81_s18 }
   0xa   :  { %v12_v3 = vld [vmem:[#allocation2] sm:$0x3]   ;;  %21 = vrot.lane.b32.xlu0 %v20_v2, %s103_s0  ;;  %33 = vrot.lane.b32.xlu1 %v20_v2, %s104_s10  ;;  %v16_v4 = vld [vmem:[#allocation2 + $0x8] sm:$0x3]  }
   0xb   :  { %14 = vst.msk [vmem:[#allocation0] ss:$16 sm:$0x3] %vm13_vm0, %v12_v3   ;;  %19 = vst.msk [vmem:[#allocation0 + $0x8] ss:$16 sm:$0x3] %vm13_vm0, %v16_v4   ;;  %p88_p3 = por %p87_p2, %p86_p1 }
   0xd   :  { %p89_p4 = pnand %p88_p3, %p82_p0 }
   0xe   :  { %27 = vrot.lane.b32.xlu0 %v20_v2, %s105_s11  ;;  %39 = vrot.lane.b32.xlu1 %v20_v2, %s106_s12 }
  0x12   :  { %45 = vrot.lane.b32.xlu0 %v20_v2, %s107_s13  ;;  %51 = vrot.lane.b32.xlu1 %v20_v2, %s108_s14 }
  0x16   :  { %57 = vrot.lane.b32.xlu0 %v20_v2, %s109_s15 }
  0x7c   :  { %v22_v5 = vpop.permute.xlu0 %21   ;;  %v34_v6 = vpop.permute.xlu1 %33  }
  0x7d   :  { %25 = vst.msk [vmem:[#allocation0 + $0x1] ss:$8 sm:$0xf] %vm13_vm0, %v22_v5   ;;  %37 = vst.msk [vmem:[#allocation0 + $0x3] ss:$8 sm:$0xf] %vm13_vm0, %v34_v6  }
  0x80   :  { %v28_v7 = vpop.permute.xlu0 %27   ;;  %v40_v8 = vpop.permute.xlu1 %39  }
  0x81   :  { %31 = vst.msk [vmem:[#allocation0 + $0x2] ss:$8 sm:$0xf] %vm13_vm0, %v28_v7   ;;  %43 = vst.msk [vmem:[#allocation0 + $0x4] ss:$8 sm:$0xf] %vm13_vm0, %v40_v8  }
  0x84   :  { %v46_v9 = vpop.permute.xlu0 %45   ;;  %v52_v10 = vpop.permute.xlu1 %51  }
  0x85   :  { %49 = vst.msk [vmem:[#allocation0 + $0x5] ss:$8 sm:$0xf] %vm13_vm0, %v46_v9   ;;  %55 = vst.msk [vmem:[#allocation0 + $0x6] ss:$8 sm:$0xf] %vm13_vm0, %v52_v10  }
  0x88   :  { %v58_v11 = vpop.permute.xlu0 %57  }
  0x89   :  { %61 = vst.msk [vmem:[#allocation0 + $0x7] ss:$8 sm:$0xf] %vm13_vm0, %v58_v11  }
  0x8a   :  { %92 = shalt.err (!%p89_p4)
}
  0x8b   :  { %69 = dma.vmem_to_hbm [thread:$0]  %s67_s17, 512, %s140_s1, [#allocation1]  }
  0x8c   :  { %101 = dma.done.wait [#allocation1], 512  }
  0x8d   :  { %102 = vsyncadd [#allocation1], 4294966784 }
  0x8e   :  { %71 = vsyncpa [#allocation1], 1 }

// kernel: acvnet_forward.1
= control target key start
LH: loop header
LB: loop body
LE: loop exit
PB: predicated region body
PF: predicated region fallthrough
CT: control target
= control target key end

     0   :  { %v2514_v0 = vlaneseq  ;;  %v1687_v1 = vmov 1   ;;  %v1688_v2 = vmov 0   ;;  %v1689_v14 = vmov 2   ;;  %s1693_s29 = smov 127   ;;  %s1695_s30 = smov 1   ;;  %s2502_s0 = inlined_call_operand.vmem [shape: f32[64,3], index: 0, kind: input, shape index: {}]   ;;  %s2503_s11 = inlined_call_operand.vmem [shape: f32[8,256], index: 11, kind: output, shape index: {}]   ;;  %s2504_s6 = inlined_call_operand.vmem [shape: f32[8,6], index: 6, kind: input, shape index: {}]   ;;  %s2505_s1 = inlined_call_operand.vmem [shape: f32[3,32], index: 1, kind: input, shape index: {}]   ;;  %s2506_s3 = inlined_call_operand.vmem [shape: f32[3,8], index: 3, kind: input, shape index: {}]   ;;  %s2507_s2 = inlined_call_operand.vmem [shape: f32[1,32], index: 2, kind: input, shape index: {}]   ;;  %s2508_s4 = inlined_call_operand.vmem [shape: f32[1,8], index: 4, kind: input, shape index: {}]   ;;  %s2509_s5 = inlined_call_operand.vmem [shape: f32[1,32], index: 5, kind: input, shape index: {}]   ;;  %s2510_s8 = inlined_call_operand.vmem [shape: f32[32,4], index: 8, kind: input, shape index: {}]   ;;  %s2511_s7 = inlined_call_operand.vmem [shape: f32[1,3], index: 7, kind: input, shape index: {}]   ;;  %s2512_s9 = inlined_call_operand.vmem [shape: f32[16,4], index: 9, kind: input, shape index: {}]   ;;  %s2513_s10 = inlined_call_operand.vmem [shape: f32[16,256], index: 10, kind: input, shape index: {}]  }
   0x1   :  { %1629 = vset.pattern.permute.xlu0 %v1687_v1  ;;  %1627 = vset.pattern.permute.xlu1 %v1688_v2  ;;  %v46_v3 = vld [vmem:[%s2502_s0 + $0x38] sm:$0xff]  ;;  %v44_v4 = vld [vmem:[%s2502_s0 + $0x28] sm:$0xff]  ;;  %v43_v7 = vld [vmem:[%s2502_s0 + $0x20] sm:$0xff]  ;;  %v1690_v17 = vmov 1.0|1.0   ;;  %vm336_vm6 = vcmask 1040384  }
   0x2   :  { %85 = vperm.xlu1 %1627, %v46_v3   ;;  %121 = vperm.xlu0 %1629, %v44_v4   ;;  %v1769_v5 = vshrl.u32 %v2514_v0, 7  ;;  %v40_v6 = vld [vmem:[%s2502_s0 + $0x8] sm:$0xff]  ;;  %v39_v11 = vld [vmem:[%s2502_s0] sm:$0xff]  ;;  %v45_v12 = vld [vmem:[%s2502_s0 + $0x30] sm:$0xff]  ;;  %v1803_v16 = vand.u32 127, %v2514_v0  ;;  %vm471_vm7 = vcmask 1041408  }
   0x3   :  { %v42_v13 = vld [vmem:[%s2502_s0 + $0x18] sm:$0xff]  ;;  %v41_v15 = vld [vmem:[%s2502_s0 + $0x10] sm:$0xff]  ;;  %v1827_v19 = vld [vmem:[%s2504_s6] sm:$0xff]  ;;  %vm358_vm8 = vcmask 261120   ;;  %vm554_vm9 = vcmask 1042432   ;;  %vm689_vm10 = vcmask 64512  }
   0x4   :  { %v1778_v8 = vadd.s32 8, %v1769_v5  ;;  %vm354_vm0 = vcmp.eq.s32.totalorder %v1803_v16, 1  ;;  %vm489_vm1 = vcmp.eq.s32.totalorder %v1803_v16, 2  ;;  %vm326_vm4 = vcmp.eq.s32.totalorder %v1803_v16, 0  ;;  %v47_v38 = vld [vmem:[%s2505_s1] sm:$0x7] }
   0x5   :  { %vm1480_vm2 = vmpackc.low %vm354_vm0, %vm354_vm0  ;;  %v90_v35 = vsub.s32 0, %v1769_v5  ;;  %v134_v36 = vsub.s32 1, %v1769_v5  ;;  %v186_v37 = vsub.s32 2, %v1769_v5  ;;  %v227_v45 = vld [vmem:[%s2506_s3] sm:$0x7]  ;;  %vm572_vm11 = vcmp.eq.s32.totalorder %v1803_v16, 3 }
   0x6   :  { %1628 = vset.pattern.permute.xlu1 %v1687_v1  ;;  %105 = vperm.xlu0 %1629, %v40_v6   ;;  %vm1493_vm3 = vmpackc.low %vm489_vm1, %vm489_vm1  ;;  %v1902_v63 = vld [vmem:[%s2507_s2] ss:$0 sm:$0xff]  ;;  %vm639_vm13 = vcmask 31744   ;;  %vm878_vm14 = vcmask 7168   ;;  %s1696_s12 = smov 2   ;;  %s1697_s13 = smov 3  }
   0x7   :  { %117 = vperm.xlu1 %1628, %v43_v7   ;;  %1553 = vmatprep.subr.msk.bf16.mxu1 %vm1480_vm2, %v1690_v17  ;;  %vm1815_vm5 = vmpackc.low %vm326_vm4, %vm326_vm4  ;;  %v1860_v39 = vrot.slane %v47_v38, %v90_v35  ;;  %v1862_v40 = vrot.slane %v47_v38, %v134_v36  ;;  %v1864_v41 = vrot.slane %v47_v38, %v186_v37  ;;  %vm986_vm15 = vcmask 15368  }
   0x8   :  { %1554 = vmatpush3.bf16.msk.msra.mxu1 %vm1480_vm2, %v1690_v17  ;;  %1569 = vmatprep.subr.msk.bf16.mxu0 %vm1493_vm3, %v1690_v17  ;;  %v1885_v54 = vrot.slane %v227_v45, %v90_v35  ;;  %v1887_v55 = vrot.slane %v227_v45, %v134_v36  ;;  %v1892_v58 = vrot.slane %v227_v45, %v186_v37  ;;  %vm2072_vm12 = vmpackc.low %vm572_vm11, %vm572_vm11  ;;  %vm1078_vm0 = vcmask 23568  }
   0x9   :  { %1570 = vmatpush3.bf16.msk.msra.mxu0 %vm1493_vm3, %v1690_v17  ;;  %1555 = vmatprep.subr.msk.bf16.mxu1 %vm1480_vm2, %v1690_v17  ;;  %vm1170_vm1 = vcmask 31768  }
   0xa   :  { %1632 = vset.pattern.permute.xlu0 %v1688_v2  ;;  %1571 = vmatprep.subr.msk.bf16.mxu0 %vm1493_vm3, %v1690_v17 }
   0xb   :  { %129 = vperm.xlu1 %1628, %v46_v3   ;;  %70 = vperm.xlu0 %1632, %v43_v7  }
   0xc   :  { %1556 = vmatpush3.bf16.msk.msra.mxu1 %vm1480_vm2, %v1690_v17 }
   0xd   :  { %1572 = vmatpush3.bf16.msk.msra.mxu0 %vm1493_vm3, %v1690_v17  ;;  %1561 = vmatprep.subr.msk.bf16.mxu1 %vm1815_vm5, %v1690_v17 }
   0xe   :  { %1585 = vmatprep.subr.mxu0 %v1827_v19 }
   0xf   :  { %1630 = vset.pattern.permute.xlu1 %v1688_v2  ;;  %75 = vperm.xlu0 %1632, %v44_v4  }
  0x10   :  { %50 = vperm.xlu1 %1630, %v39_v11  }
  0x13   :  { %55 = vperm.xlu0 %1632, %v40_v6  }
  0x14   :  { %80 = vperm.xlu1 %1630, %v45_v12  }
  0x17   :  { %65 = vperm.xlu0 %1632, %v42_v13  }
  0x18   :  { %1631 = vset.pattern.permute.xlu1 %v1687_v1 }
  0x19   :  { %101 = vperm.xlu1 %1631, %v39_v11  }
  0x1b   :  { %1635 = vset.pattern.permute.xlu0 %v1689_v14 }
  0x1c   :  { %169 = vperm.xlu0 %1635, %v43_v7  }
  0x1d   :  { %125 = vperm.xlu1 %1631, %v45_v12  }
  0x20   :  { %153 = vperm.xlu0 %1635, %v39_v11  }
  0x21   :  { %1633 = vset.pattern.permute.xlu1 %v1688_v2 }
  0x22   :  { %60 = vperm.xlu1 %1633, %v41_v15  }
  0x24   :  { %177 = vperm.xlu0 %1635, %v45_v12  }
  0x26   :  { %1634 = vset.pattern.permute.xlu1 %v1687_v1 }
  0x27   :  { %109 = vperm.xlu1 %1634, %v41_v15  }
  0x28   :  { %165 = vperm.xlu0 %1635, %v42_v13  }
  0x2b   :  { %113 = vperm.xlu1 %1634, %v42_v13  }
  0x2f   :  { %1636 = vset.pattern.permute.xlu1 %v1689_v14 }
  0x30   :  { %173 = vperm.xlu1 %1636, %v44_v4  }
  0x34   :  { %181 = vperm.xlu1 %1636, %v46_v3  }
  0x38   :  { %157 = vperm.xlu1 %1636, %v40_v6  }
  0x3c   :  { %161 = vperm.xlu1 %1636, %v41_v15  }
  0x40   :  { %1637 = vset.pattern.permute.xlu1 %v1688_v2 }
  0x7d   :  { %v1830_v20 = vpop.permute.xlu1 %85  ;;  %v122_v21 = vpop.permute.xlu0 %121 }
  0x7e   :  { %v141_v49 = vmul.f32 %v1862_v40, %v122_v21  ;;  %v99_v61 = vmul.f32 %v1860_v39, %v1830_v20  ;;  %v1917_v35 = vmul.f32 %v1887_v55, %v122_v21  ;;  %v239_v16 = vmul.f32 %v1885_v54, %v1830_v20 }
  0x81   :  { %v1832_v22 = vpop.permute.xlu0 %105 }
  0x82   :  { %v1834_v23 = vpop.permute.xlu1 %117 }
  0x83   :  { %v140_v46 = vmul.f32 %v1862_v40, %v1834_v23 }
  0x86   :  { %v1836_v24 = vpop.permute.xlu1 %129  ;;  %v1838_v25 = vpop.permute.xlu0 %70 }
  0x87   :  { %v96_v44 = vmul.f32 %v1860_v39, %v1838_v25  ;;  %v143_v7 = vmul.f32 %v1862_v40, %v1836_v24 }
  0x89   :  { %v148_v50 = vadd.f32 %v140_v46, %v96_v44 }
  0x8a   :  { %v1840_v26 = vpop.permute.xlu0 %75 }
  0x8b   :  { %v51_v27 = vpop.permute.xlu1 %50  ;;  %v97_v51 = vmul.f32 %v1860_v39, %v1840_v26 }
  0x8c   :  { %v92_v57 = vmul.f32 %v1860_v39, %v51_v27  ;;  %v232_v44 = vmul.f32 %v1885_v54, %v51_v27 }
  0x8d   :  { %v149_v11 = vadd.f32 %v141_v49, %v97_v51 }
  0x8e   :  { %v1844_v29 = vpop.permute.xlu0 %55 }
  0x8f   :  { %v1842_v28 = vpop.permute.xlu1 %80  ;;  %v93_v27 = vmul.f32 %v1860_v39, %v1844_v29 }
  0x90   :  { %v98_v62 = vmul.f32 %v1860_v39, %v1842_v28 }
  0x92   :  { %v1846_v31 = vpop.permute.xlu0 %65 }
  0x93   :  { %v95_v36 = vmul.f32 %v1860_v39, %v1846_v31 }
  0x94   :  { %v102_v30 = vpop.permute.xlu1 %101 }
  0x95   :  { %v136_v52 = vmul.f32 %v1862_v40, %v102_v30  ;;  %v244_v37 = vmul.f32 %v1887_v55, %v102_v30  ;;  %v151_v30 = vadd.f32 %v143_v7, %v99_v61  ;;  %v1946_v61 = vmul.f32 %v1885_v54, %v1838_v25 }
  0x97   :  { %v1850_v33 = vpop.permute.xlu0 %169  ;;  %v144_v12 = vadd.f32 %v136_v52, %v92_v57  ;;  %v137_v57 = vmul.f32 %v1862_v40, %v1832_v22 }
  0x98   :  { %v1848_v32 = vpop.permute.xlu1 %125  ;;  %v192_v47 = vmul.f32 %v1864_v41, %v1850_v33 }
  0x99   :  { %v142_v56 = vmul.f32 %v1862_v40, %v1848_v32 }
  0x9a   :  { %v200_v59 = vadd.f32 %v192_v47, %v148_v50 }
  0x9b   :  { %v154_v42 = vpop.permute.xlu0 %153  ;;  %v150_v38 = vadd.f32 %v142_v56, %v98_v62 }
  0x9c   :  { %v188_v60 = vmul.f32 %v1864_v41, %v154_v42  ;;  %v215_v45 = vadd.f32 %v1902_v63, %v200_v59  ;;  %v264_v49 = vmul.f32 %v1892_v58, %v154_v42  ;;  %v245_v42 = vmul.f32 %v1887_v55, %v1832_v22 }
  0x9d   :  { %v1852_v34 = vpop.permute.xlu1 %60  ;;  %v233_v59 = vmul.f32 %v1885_v54, %v1844_v29 }
  0x9e   :  { %v196_v46 = vadd.f32 %v188_v60, %v144_v12  ;;  %v252_v60 = vadd.f32 %v244_v37, %v232_v44  ;;  %v1949_v22 = vmax.f32 %v215_v45, 0.0  ;;  %v1960_v44 = vmul.f32 %v1885_v54, %v1846_v31  ;;  %v1477_v31 = vld [vmem:[%s2509_s5] ss:$0 sm:$0xff] }
  0x9f   :  { %v1883_v53 = vpop.permute.xlu0 %177  ;;  %v94_v45 = vmul.f32 %v1860_v39, %v1852_v34 }
  0xa0   :  { %v194_v3 = vmul.f32 %v1864_v41, %v1883_v53 }
  0xa2   :  { %v1866_v43 = vpop.permute.xlu1 %109  ;;  %v202_v50 = vadd.f32 %v194_v3, %v150_v38  ;;  %v1942_v3 = vmul.f32 %v1887_v55, %v1834_v23  ;;  %v1956_v38 = vadd.f32 %v245_v42, %v233_v59  ;;  %v472_v59 = vrot.slane %v1949_v22, 6 }
  0xa3   :  { %v1912_v13 = vpop.permute.xlu0 %165  ;;  %v138_v23 = vmul.f32 %v1862_v40, %v1866_v43 }
  0xa4   :  { %v191_v21 = vmul.f32 %v1864_v41, %v1912_v13  ;;  %v217_v29 = vadd.f32 %v1902_v63, %v202_v50 }
  0xa6   :  { %v1877_v48 = vpop.permute.xlu1 %113 }
  0xa7   :  { %v139_v4 = vmul.f32 %v1862_v40, %v1877_v48 }
  0xa9   :  { %v147_v51 = vadd.f32 %v139_v4, %v95_v36  ;;  %v211_v4 = vadd.f32 %v1902_v63, %v196_v46  ;;  %v145_v36 = vadd.f32 %v137_v57, %v93_v27  ;;  %v337_v27 = vrot.slane %v1949_v22, 7 }
  0xab   :  { %v1908_v6 = vpop.permute.xlu1 %173  ;;  %v199_v12 = vadd.f32 %v191_v21, %v147_v51  ;;  %v219_v40 = vmax.f32 %v211_v4, 0.0  ;;  %v1981_v21 = vmax.f32 %v217_v29, 0.0  ;;  %v246_v29 = vmul.f32 %v1887_v55, %v1866_v43 }
  0xac   :  { %v193_v15 = vmul.f32 %v1864_v41, %v1908_v6 }
  0xad   :  { %v214_v57 = vadd.f32 %v1902_v63, %v199_v12 }
  0xae   :  { %v201_v47 = vadd.f32 %v193_v15, %v149_v11  ;;  %v272_v11 = vadd.f32 %v264_v49, %v252_v60  ;;  %v234_v49 = vmul.f32 %v1885_v54, %v1852_v34 }
  0xaf   :  { %v1927_v52 = vpop.permute.xlu1 %181 }
  0xb0   :  { %v195_v56 = vmul.f32 %v1864_v41, %v1927_v52  ;;  %v216_v62 = vadd.f32 %v1902_v63, %v201_v47  ;;  %v1969_v47 = vld [vmem:[%s2508_s4] ss:$0 sm:$0xff] }
  0xb1   :  { %v1979_v39 = vadd.f32 %v1969_v47, %v272_v11  ;;  %v1992_v11 = vmul.f32 %v1477_v31, %v219_v40 }
  0xb2   :  { %v203_v7 = vadd.f32 %v195_v56, %v151_v30  ;;  %v1964_v46 = vmax.f32 %v216_v62, 0.0  ;;  %v146_v56 = vadd.f32 %v138_v23, %v94_v45  ;;  %v340_v23 = vrot.slane %v1981_v21, 7 }
  0xb3   :  { %v158_v15 = vpop.permute.xlu1 %157  ;;  %v475_v45 = vrot.slane %v1981_v21, 6 }
  0xb4   :  { %v218_v37 = vadd.f32 %v1902_v63, %v203_v7  ;;  %v189_v25 = vmul.f32 %v1864_v41, %v158_v15  ;;  %v338_v62 = vrot.slane %v1964_v46, 7  ;;  %v473_v7 = vrot.slane %v1964_v46, 6 }
  0xb6   :  { %v1973_v50 = vmax.f32 %v218_v37, 0.0  ;;  %v197_v51 = vadd.f32 %v189_v25, %v145_v36  ;;  %v339_v43 = vsel %vm336_vm6, %v337_v27, %v338_v62 }
  0xb7   :  { %v162_v30 = vpop.permute.xlu1 %161 }
  0xb8   :  { %v212_v34 = vadd.f32 %v1902_v63, %v197_v51  ;;  %v190_v42 = vmul.f32 %v1864_v41, %v162_v30  ;;  %v331_v60 = vrot.slane %v1973_v50, 7  ;;  %v469_v4 = vrot.slane %v1973_v50, 6 }
  0xb9   :  { %v222_v41 = vmax.f32 %v214_v57, 0.0  ;;  %v267_v51 = vmul.f32 %v1892_v58, %v1912_v13  ;;  %v474_v57 = vsel %vm471_vm7, %v472_v59, %v473_v7 }
  0xba   :  { %v220_v12 = vmax.f32 %v212_v34, 0.0  ;;  %v198_v36 = vadd.f32 %v190_v42, %v146_v56  ;;  %v347_v37 = vsel %vm336_vm6, %v331_v60, %v337_v27  ;;  %v482_v25 = vsel %vm471_vm7, %v469_v4, %v472_v59 }
  0xbb   :  { %v348_v56 = vmul.f32 %v347_v37, %v1992_v11  ;;  %v342_v34 = vsel %vm336_vm6, %v340_v23, %v331_v60  ;;  %v483_v9 = vmul.f32 %v482_v25, %v1992_v11  ;;  %v265_v27 = vmul.f32 %v1892_v58, %v158_v15 }
  0xbc   :  { %v2002_v0 = vmul.f32 %v1477_v31, %v220_v12  ;;  %v213_v40 = vadd.f32 %v1902_v63, %v198_v36  ;;  %v247_v63 = vmul.f32 %v1887_v55, %v1877_v48  ;;  %v2014_v12 = vmul.f32 %v1477_v31, %v222_v41 }
  0xbd   :  { %v477_v36 = vsel %vm471_vm7, %v475_v45, %v469_v4  ;;  %v320_v4 = vmul.f32 %v1992_v11, %v1949_v22 }
  0xbe   :  { %v221_v42 = vmax.f32 %v213_v40, 0.0  ;;  %v349_v10 = vmul.f32 %v339_v43, %v2002_v0  ;;  %v484_v13 = vmul.f32 %v474_v57, %v2002_v0  ;;  %v341_v40 = vsel %vm336_vm6, %v338_v62, %v340_v23 }
  0xbf   :  { %v266_v43 = vmul.f32 %v1892_v58, %v162_v30  ;;  %v351_v25 = vmul.f32 %v342_v34, %v2014_v12  ;;  %v476_v57 = vsel %vm471_vm7, %v473_v7, %v475_v45  ;;  %v321_v48 = vmul.f32 %v2002_v0, %v1964_v46 }
  0xc0   :  { %v2018_v59 = vmul.f32 %v1477_v31, %v221_v42  ;;  %v352_v60 = vpack.c.bf16 %v349_v10, %v348_v56  ;;  %v487_v37 = vpack.c.bf16 %v484_v13, %v483_v9  ;;  %v486_v9 = vmul.f32 %v477_v36, %v2014_v12 }
  0xc1   :  { %v254_v31 = vadd.f32 %v246_v29, %v234_v49  ;;  %v255_v30 = vadd.f32 %v247_v63, %v1960_v44  ;;  %v556_v62 = vrot.slane %v1964_v46, 5  ;;  %v552_v7 = vrot.slane %v1973_v50, 5 }
  0xc2   :  { %1557 = vmatprep.mubr.msk.bf16.mxu1 %vm358_vm8, %v352_v60  ;;  %1573 = vmatprep.mubr.msk.bf16.mxu0 %vm358_vm8, %v487_v37  ;;  %v350_v15 = vmul.f32 %v341_v40, %v2018_v59  ;;  %v485_v10 = vmul.f32 %v476_v57, %v2018_v59  ;;  %v273_v23 = vadd.f32 %v265_v27, %v1956_v38  ;;  %v555_v49 = vrot.slane %v1949_v22, 5 }
  0xc3   :  { %v256_v56 = vadd.f32 %v1942_v3, %v1946_v61  ;;  %v268_v34 = vmul.f32 %v1892_v58, %v1850_v33  ;;  %v324_v44 = vpack.c.bf16 %v321_v48, %v320_v4  ;;  %v237_v46 = vmul.f32 %v1885_v54, %v1840_v26 }
  0xc4   :  { %v353_v41 = vpack.c.bf16 %v351_v25, %v350_v15  ;;  %v488_v45 = vpack.c.bf16 %v486_v9, %v485_v10  ;;  %v250_v29 = vmul.f32 %v1887_v55, %v1848_v32  ;;  %v295_v42 = vmax.f32 %v1979_v39, 0.0 }
  0xc5   :  { %v274_v38 = vadd.f32 %v266_v43, %v254_v31  ;;  %v275_v3 = vadd.f32 %v267_v51, %v255_v30  ;;  %v269_v33 = vmul.f32 %v1892_v58, %v1908_v6  ;;  %v557_v26 = vsel %vm554_vm9, %v555_v49, %v556_v62 }
  0xc6   :  { %1558 = vmatmul.mubr.msk.bf16.vlgmr.msra.gmra.mxu1 %vm358_vm8, %v353_v41  ;;  %1574 = vmatmul.mubr.msk.bf16.vlgmr.msra.gmra.mxu0 %vm358_vm8, %v488_v45  ;;  %v288_v32 = vadd.f32 %v1969_v47, %v273_v23  ;;  %v322_v61 = vmul.f32 %v2018_v59, %v1981_v21  ;;  %v565_v6 = vsel %vm554_vm9, %v552_v7, %v555_v49 }
  0xc7   :  { %1562 = vmatpush3.bf16.msk.msra.mxu1 %vm1815_vm5, %v1690_v17  ;;  %1565 = vmatprep.mubr.msk.bf16.mxu1 %vm358_vm8, %v324_v44  ;;  %v238_v22 = vmul.f32 %v1885_v54, %v1842_v28  ;;  %v276_v39 = vadd.f32 %v268_v34, %v256_v56  ;;  %v270_v51 = vmul.f32 %v1892_v58, %v1883_v53 }
  0xc8   :  { %1587 = vmatprep.mubr.msk.f32.mxu0 %vm689_vm10, %v295_v42  ;;  %1563 = vmatprep.subr.msk.bf16.mxu1 %vm1815_vm5, %v1690_v17  ;;  %v567_v63 = vmul.f32 %v557_v26, %v2002_v0  ;;  %v251_v27 = vmul.f32 %v1887_v55, %v1836_v24  ;;  %v257_v28 = vadd.f32 %v1917_v35, %v237_v46  ;;  %v296_v55 = vmax.f32 %v288_v32, 0.0 }
  0xc9   :  { %1586 = vmatpush3.msra.mxu0 %v1827_v19  ;;  %v289_v36 = vadd.f32 %v1969_v47, %v274_v38  ;;  %v323_v53 = vmul.f32 %v2014_v12, %v1973_v50  ;;  %v258_v60 = vadd.f32 %v250_v29, %v238_v22  ;;  %v290_v37 = vadd.f32 %v1969_v47, %v275_v3 }
  0xca   :  { %v566_v0 = vmul.f32 %v565_v6, %v1992_v11  ;;  %v277_v19 = vadd.f32 %v269_v33, %v257_v28  ;;  %v271_v24 = vmul.f32 %v1892_v58, %v1927_v52  ;;  %v291_v20 = vadd.f32 %v1969_v47, %v276_v39 }
  0xcb   :  { %1564 = vmatpush3.bf16.msk.msra.mxu1 %vm1815_vm5, %v1690_v17  ;;  %v325_v35 = vpack.c.bf16 %v323_v53, %v322_v61  ;;  %v278_v54 = vadd.f32 %v270_v51, %v258_v60  ;;  %v558_v50 = vrot.slane %v1981_v21, 5  ;;  %v259_v18 = vadd.f32 %v251_v27, %v239_v16  ;;  %v2135_v61 = vld [vmem:[%s2510_s8 + $0x10] sm:$0xff] }
  0xcc   :  { %1577 = vmatprep.subr.msk.bf16.mxu1 %vm2072_vm12, %v1690_v17  ;;  %v570_v40 = vpack.c.bf16 %v567_v63, %v566_v0  ;;  %v297_v43 = vmax.f32 %v289_v36, 0.0  ;;  %v298_v11 = vmax.f32 %v290_v37, 0.0  ;;  %v292_v21 = vadd.f32 %v1969_v47, %v277_v19  ;;  %v2140_v63 = vld [vmem:[%s2510_s8] sm:$0xff] }
  0xcd   :  { %v559_v58 = vsel %vm554_vm9, %v556_v62, %v558_v50  ;;  %v560_v52 = vsel %vm554_vm9, %v558_v50, %v552_v7  ;;  %v279_v25 = vadd.f32 %v271_v24, %v259_v18  ;;  %v299_v48 = vmax.f32 %v291_v20, 0.0  ;;  %v2148_v24 = vld [vmem:[%s2510_s8 + $0x18] sm:$0xff] }
  0xce   :  { %1566 = vmatmul.mubr.msk.bf16.vlgmr.msra.gmra.mxu1 %vm358_vm8, %v325_v35  ;;  %1588 = vmatmul.mubr.msk.f32.vlgmr.msra.gmra.mxu0 %vm689_vm10, %v296_v55  ;;  %v568_v57 = vmul.f32 %v559_v58, %v2018_v59  ;;  %v293_v15 = vadd.f32 %v1969_v47, %v278_v54  ;;  %v569_v10 = vmul.f32 %v560_v52, %v2014_v12  ;;  %v300_v9 = vmax.f32 %v292_v21, 0.0  ;;  %v2156_v58 = vld [vmem:[%s2510_s8 + $0x8] sm:$0xff]  ;;  %s1691_s8 = smov 125  }
  0xcf   :  { %1578 = vmatpush3.bf16.msk.msra.mxu1 %vm2072_vm12, %v1690_v17  ;;  %1581 = vmatprep.mubr.msk.bf16.mxu1 %vm358_vm8, %v570_v40  ;;  %v294_v31 = vadd.f32 %v1969_v47, %v279_v25 }
  0xd0   :  { %1590 = vmatprep.mubr.msk.f32.mxu0 %vm689_vm10, %v297_v43  ;;  %1579 = vmatprep.subr.msk.bf16.mxu1 %vm2072_vm12, %v1690_v17  ;;  %v571_v30 = vpack.c.bf16 %v569_v10, %v568_v57  ;;  %v301_v62 = vmax.f32 %v293_v15, 0.0 }
  0xd1   :  { %v302_v59 = vmax.f32 %v294_v31, 0.0 }
  0xd2   :  { %1591 = vmatmul.mubr.msk.f32.gmra.mxu0 %vm689_vm10, %v298_v11 }
  0xd3   :  { %1580 = vmatpush3.bf16.msk.msra.mxu1 %vm2072_vm12, %v1690_v17  ;;  %1593 = vmatprep.mubr.msk.f32.mxu0 %vm689_vm10, %v299_v48 }
  0xd6   :  { %1582 = vmatmul.mubr.msk.bf16.vlgmr.msra.gmra.mxu1 %vm358_vm8, %v571_v30  ;;  %1594 = vmatmul.mubr.msk.f32.gmra.mxu0 %vm689_vm10, %v300_v9 }
  0xd7   :  { %1596 = vmatprep.mubr.msk.f32.mxu0 %vm689_vm10, %v301_v62 }
  0xda   :  { %1597 = vmatmul.mubr.msk.f32.gmra.mxu0 %vm689_vm10, %v302_v59 }
 0x186   :  { %v1559_v12 = vpop.f32.mrf.mxu1  ;;  %v1575_v4 = vpop.f32.mrf.mxu0 }
 0x188   :  { %v399_v7 = vpop.f32.mrf.mxu1  ;;  %v533_v17 = vpop.f32.mrf.mxu0 }
 0x18a   :  { %v1560_v23 = vpop.f32.mrf.mxu1  ;;  %v1576_v41 = vpop.f32.mrf.mxu0 }
 0x18c   :  { %v402_v45 = vpop.f32.mrf.mxu1  ;;  %v536_v56 = vpop.f32.mrf.mxu0 }
 0x18e   :  { %v1567_v47 = vpop.f32.mrf.mxu1  ;;  %v2124_v34 = vpop.f32.mrf.mxu0 }
 0x18f   :  { %v463_v46 = vadd.f32 %v1567_v47, %v1559_v12 }
 0x190   :  { %v454_v49 = vpop.f32.mrf.mxu1  ;;  %v2126_v44 = vpop.f32.mrf.mxu0 }
 0x191   :  { %v455_v38 = vadd.f32 %v454_v49, %v399_v7  ;;  %v550_v32 = vadd.f32 %v1575_v4, %v463_v46 }
 0x192   :  { %v1568_v29 = vpop.f32.mrf.mxu1  ;;  %v2128_v42 = vpop.f32.mrf.mxu0 }
 0x193   :  { %v466_v3 = vadd.f32 %v1568_v29, %v1560_v23  ;;  %v548_v13 = vadd.f32 %v533_v17, %v455_v38 }
 0x194   :  { %v457_v33 = vpop.f32.mrf.mxu1  ;;  %v2130_v26 = vpop.f32.mrf.mxu0 }
 0x195   :  { %v458_v39 = vadd.f32 %v457_v33, %v402_v45  ;;  %v551_v36 = vadd.f32 %v1576_v41, %v466_v3 }
 0x196   :  { %v1583_v6 = vpop.f32.mrf.mxu1  ;;  %v1595_v22 = vpop.f32.mrf.mxu0 }
 0x197   :  { %v633_v51 = vadd.f32 %v1583_v6, %v550_v32  ;;  %v922_v0 = vrot.slane %v1595_v22, 7  ;;  %v1014_v19 = vrot.slane %v1595_v22, 6  ;;  %v1106_v20 = vrot.slane %v1595_v22, 5 }
 0x198   :  { %v616_v27 = vpop.f32.mrf.mxu1  ;;  %v800_v28 = vpop.f32.mrf.mxu0  ;;  %v549_v40 = vadd.f32 %v536_v56, %v458_v39 }
 0x199   :  { %v2143_v53 = vmul.f32 %v633_v51, %v2135_v61  ;;  %v631_v16 = vadd.f32 %v616_v27, %v548_v13  ;;  %v921_v60 = vrot.slane %v800_v28, 7  ;;  %v1013_v37 = vrot.slane %v800_v28, 6 }
 0x19a   :  { %v1584_v55 = vpop.f32.mrf.mxu1  ;;  %v1598_v35 = vpop.f32.mrf.mxu0  ;;  %v1105_v18 = vrot.slane %v800_v28, 5 }
 0x19b   :  { %822 = vst.msk [vmem:[#allocation2 + $0x10] sm:$0xff] %vm639_vm13, %v2143_v53  ;;  %v635_v54 = vmul.f32 %v631_v16, %v2140_v63  ;;  %v634_v50 = vadd.f32 %v1584_v55, %v551_v36  ;;  %v1103_v43 = vrot.slane %v1598_v35, 5  ;;  %v2159_v21 = vsel %vm336_vm6, %v921_v60, %v922_v0 }
 0x19c   :  { %v619_v52 = vpop.f32.mrf.mxu1  ;;  %v810_v11 = vpop.f32.mrf.mxu0  ;;  %v2162_v25 = vsel %vm471_vm7, %v1013_v37, %v1014_v19  ;;  %v919_v9 = vrot.slane %v1598_v35, 7  ;;  %v1011_v31 = vrot.slane %v1598_v35, 6  ;;  %v1107_v45 = vsel %vm554_vm9, %v1105_v18, %v1106_v20 }
 0x19d   :  { %820 = vst.msk [vmem:[#allocation2] sm:$0xff] %vm639_vm13, %v635_v54  ;;  %v638_v57 = vmul.f32 %v634_v50, %v2148_v24  ;;  %v632_v48 = vadd.f32 %v619_v52, %v549_v40  ;;  %v924_v15 = vrot.slane %v810_v11, 7  ;;  %v1016_v10 = vrot.slane %v810_v11, 6 }
 0x19e   :  { %v1108_v30 = vrot.slane %v810_v11, 5  ;;  %v640_v62 = vsel %vm639_vm13, %v635_v54, -inf  ;;  %v1112_v4 = vsel %vm554_vm9, %v1103_v43, %v1105_v18  ;;  %v646_v49 = vsel %vm639_vm13, %v2143_v53, -inf }
 0x19f   :  { %823 = vst.msk [vmem:[#allocation2 + $0x18] sm:$0xff] %vm639_vm13, %v638_v57  ;;  %v636_v59 = vmul.f32 %v632_v48, %v2156_v58  ;;  %641 = vmax.xlane.f32.xlu1 %v640_v62  ;;  %v1017_v12 = vsel %vm471_vm7, %v1014_v19, %v1016_v10  ;;  %v926_v17 = vsel %vm336_vm6, %v924_v15, %v919_v9  ;;  %v649_v47 = vsel %vm639_vm13, %v638_v57, -inf }
 0x1a0   :  { %v1109_v7 = vsel %vm554_vm9, %v1106_v20, %v1108_v30  ;;  %v1018_v23 = vsel %vm471_vm7, %v1016_v10, %v1011_v31  ;;  %v1110_v56 = vsel %vm554_vm9, %v1108_v30, %v1103_v43  ;;  %v925_v46 = vsel %vm336_vm6, %v922_v0, %v924_v15 }
 0x1a1   :  { %821 = vst.msk [vmem:[#allocation2 + $0x8] sm:$0xff] %vm639_vm13, %v636_v59  ;;  %v643_v41 = vsel %vm639_vm13, %v636_v59, -inf  ;;  %v1020_v29 = vsel %vm471_vm7, %v1011_v31, %v1013_v37  ;;  %v928_v38 = vsel %vm336_vm6, %v919_v9, %v921_v60 }
 0x1a2   :  { %644 = vmax.xlane.f32.xlu0 %v643_v41 }
 0x1a3   :  { %650 = vmax.xlane.f32.xlu1 %v649_v47 }
 0x1a6   :  { %647 = vmax.xlane.f32.xlu0 %v646_v49 }
 0x1b4   :  { %830 = vrot.lane.b32.xlu1 %v1595_v22, %s1691_s8 }
 0x1b8   :  { %832 = vrot.lane.b32.xlu1 %v810_v11, %s1691_s8 }
 0x1bc   :  { %934 = vrot.lane.b32.xlu1 %v925_v46, %s1691_s8  ;;  %828 = vrot.lane.b32.xlu0 %v800_v28, %s1691_s8 }
 0x1c0   :  { %1022 = vrot.lane.b32.xlu1 %v1020_v29, %s1691_s8  ;;  %834 = vrot.lane.b32.xlu0 %v1598_v35, %s1691_s8 }
 0x1c4   :  { %930 = vrot.lane.b32.xlu0 %v928_v38, %s1691_s8 }
 0x228   :  { %v642_v3 = vpop.xlane.xlu1 %641 }
 0x229   :  { %v652_v39 = vsub.f32 %v635_v54, %v642_v3 }
 0x22b   :  { %v645_v33 = vpop.xlane.xlu0 %644  ;;  %v656_v36 = vmul.f32 1.442695, %v652_v39 }
 0x22c   :  { %v653_v32 = vsub.f32 %v636_v59, %v645_v33  ;;  %v651_v6 = vpop.xlane.xlu1 %650 }
 0x22d   :  { %v655_v22 = vsub.f32 %v638_v57, %v651_v6 }
 0x22e   :  { %v658_v51 = vmul.f32 1.442695, %v653_v32 }
 0x22f   :  { %v662_v13 = vmul.f32 1.442695, %v655_v22  ;;  %v648_v27 = vpop.xlane.xlu0 %647 }
 0x230   :  { %v654_v28 = vsub.f32 %v2143_v53, %v648_v27  ;;  %v2207_v54 = vpop.permute.xlu1 %830 }
 0x231   :  { %1651 = vpow2.f32 %v662_v13  ;;  %v841_v27 = vadd.f32 %v2124_v34, %v2207_v54 }
 0x232   :  { %v660_v16 = vmul.f32 1.442695, %v654_v28  ;;  %1653 = vpow2.f32 %v658_v51 }
 0x233   :  { %v2209_v50 = vpop.permute.xlu0 %828 }
 0x234   :  { %1655 = vpow2.f32 %v660_v16  ;;  %v2211_v40 = vpop.permute.xlu1 %832 }
 0x235   :  { %1657 = vpow2.f32 %v656_v36 }
 0x237   :  { %v2213_v18 = vpop.permute.xlu0 %834 }
 0x238   :  { %v2215_v43 = vpop.permute.xlu1 %934 }
 0x239   :  { %v944_v3 = vadd.f32 %v2215_v43, %v2130_v26 }
 0x23b   :  { %v2217_v52 = vpop.permute.xlu0 %930 }
 0x23c   :  { %v2219_v11 = vpop.permute.xlu1 %1022 }
 0x23e   :  { %v1652_v60 = vpop.eup %1651 }
 0x23f   :  { %v673_v37 = vsel %vm639_vm13, %v1652_v60, 0.0  ;;  %v1654_v0 = vpop.eup %1653 }
 0x240   :  { %674 = vadd.xlane.f32.xlu1 %v673_v37  ;;  %v667_v20 = vsel %vm639_vm13, %v1654_v0, 0.0 }
 0x241   :  { %v1656_v19 = vpop.eup %1655 }
 0x242   :  { %v670_v55 = vsel %vm639_vm13, %v1656_v19, 0.0  ;;  %v1658_v35 = vpop.eup %1657 }
 0x243   :  { %671 = vadd.xlane.f32.xlu0 %v670_v55  ;;  %v664_v53 = vsel %vm639_vm13, %v1658_v35, 0.0 }
 0x244   :  { %668 = vadd.xlane.f32.xlu1 %v667_v20  ;;  %v840_v20 = vadd.f32 %v2209_v50, %v2126_v44 }
 0x247   :  { %665 = vadd.xlane.f32.xlu0 %v664_v53 }
 0x255   :  { %1026 = vrot.lane.b32.xlu1 %v1017_v12, %s1691_s8 }
 0x259   :  { %1114 = vrot.lane.b32.xlu1 %v1112_v4, %s1691_s8 }
 0x25d   :  { %1118 = vrot.lane.b32.xlu1 %v1109_v7, %s1691_s8  ;;  %932 = vrot.lane.b32.xlu0 %v2159_v21, %s1691_s8 }
 0x261   :  { %936 = vrot.lane.b32.xlu0 %v926_v17, %s1691_s8 }
 0x265   :  { %1024 = vrot.lane.b32.xlu0 %v2162_v25, %s1691_s8 }
 0x269   :  { %1028 = vrot.lane.b32.xlu0 %v1018_v23, %s1691_s8  ;;  %v1692_v23 = vmov 3  }
 0x26d   :  { %1116 = vrot.lane.b32.xlu0 %v1107_v45, %s1691_s8 }
 0x271   :  { %1120 = vrot.lane.b32.xlu0 %v1110_v56, %s1691_s8 }
 0x2c9   :  { %v675_v25 = vpop.xlane.xlu1 %674 }
 0x2cc   :  { %v672_v21 = vpop.xlane.xlu0 %671 }
 0x2cd   :  { %1659 = vrcp.f32 %v672_v21  ;;  %v669_v48 = vpop.xlane.xlu1 %668 }
 0x2ce   :  { %1661 = vrcp.f32 %v675_v25 }
 0x2d0   :  { %v666_v57 = vpop.xlane.xlu0 %665 }
 0x2d1   :  { %1663 = vrcp.f32 %v666_v57  ;;  %v1027_v41 = vpop.permute.xlu1 %1026 }
 0x2d2   :  { %1665 = vrcp.f32 %v669_v48  ;;  %v1036_v51 = vadd.f32 %v1027_v41, %v2130_v26 }
 0x2d5   :  { %v2240_v56 = vpop.permute.xlu1 %1114 }
 0x2d9   :  { %v1119_v47 = vpop.permute.xlu1 %1118 }
 0x2da   :  { %v1660_v15 = vpop.eup %1659  ;;  %v1128_v55 = vadd.f32 %v1119_v47, %v2130_v26 }
 0x2db   :  { %v682_v10 = vmul.f32 %v1660_v15, %v1656_v19  ;;  %v1662_v9 = vpop.eup %1661 }
 0x2dc   :  { %v683_v12 = vmul.f32 %v1662_v9, %v1652_v60 }
 0x2dd   :  { %v686_v31 = vmul.f32 %v682_v10, %v2135_v61  ;;  %v942_v10 = vadd.f32 %v2217_v52, %v2126_v44  ;;  %v1034_v52 = vadd.f32 %v2219_v11, %v2126_v44 }
 0x2de   :  { %v1664_v30 = vpop.eup %1663  ;;  %v687_v7 = vmul.f32 %v683_v12, %v2148_v24 }
 0x2df   :  { %856 = vperm.xlu1 %1637, %v686_v31   ;;  %v680_v62 = vmul.f32 %v1664_v30, %v1658_v35  ;;  %v1666_v4 = vpop.eup %1665 }
 0x2e0   :  { %v681_v17 = vmul.f32 %v1666_v4, %v1654_v0 }
 0x2e1   :  { %v684_v59 = vmul.f32 %v680_v62, %v2140_v63  ;;  %v933_v63 = vpop.permute.xlu0 %932 }
 0x2e2   :  { %v685_v61 = vmul.f32 %v681_v17, %v2156_v58  ;;  %v943_v19 = vadd.f32 %v2124_v34, %v933_v63  ;;  %v1126_v63 = vadd.f32 %v2240_v56, %v2126_v44 }
 0x2e3   :  { %1039 = vperm.xlu0 %1635, %v684_v59   ;;  %1638 = vset.pattern.permute.xlu1 %v1687_v1 }
 0x2e4   :  { %955 = vperm.xlu1 %1638, %v686_v31  }
 0x2e5   :  { %v2234_v24 = vpop.permute.xlu0 %936 }
 0x2e7   :  { %1051 = vperm.xlu0 %1635, %v687_v7  }
 0x2e8   :  { %1639 = vset.pattern.permute.xlu1 %v1689_v14 }
 0x2e9   :  { %1047 = vperm.xlu1 %1639, %v686_v31   ;;  %v2236_v58 = vpop.permute.xlu0 %1024 }
 0x2ea   :  { %v1035_v56 = vadd.f32 %v2124_v34, %v2236_v58 }
 0x2eb   :  { %1647 = vset.pattern.permute.xlu0 %v1688_v2 }
 0x2ec   :  { %851 = vperm.xlu0 %1647, %v685_v61  }
 0x2ed   :  { %1640 = vset.pattern.permute.xlu1 %v1692_v23  ;;  %v2238_v45 = vpop.permute.xlu0 %1028 }
 0x2ee   :  { %1139 = vperm.xlu1 %1640, %v686_v31  }
 0x2f0   :  { %1648 = vset.pattern.permute.xlu0 %v1687_v1 }
 0x2f1   :  { %951 = vperm.xlu0 %1648, %v685_v61  }
 0x2f2   :  { %1641 = vset.pattern.permute.xlu1 %v1688_v2 }
 0x2f3   :  { %846 = vperm.xlu1 %1641, %v684_v59  }
 0x2f5   :  { %1650 = vset.pattern.permute.xlu0 %v1692_v23 }
 0x2f6   :  { %1135 = vperm.xlu0 %1650, %v685_v61  }
 0x2f7   :  { %1642 = vset.pattern.permute.xlu1 %v1687_v1 }
 0x2f8   :  { %947 = vperm.xlu1 %1642, %v684_v59  }
 0x2fc   :  { %1643 = vset.pattern.permute.xlu1 %v1692_v23 }
 0x2fd   :  { %1131 = vperm.xlu1 %1643, %v684_v59   ;;  %v843_v59 = vadd.f32 %v2128_v42, %v2213_v18 }
 0x301   :  { %1644 = vset.pattern.permute.xlu1 %v1688_v2  ;;  %v1117_v2 = vpop.permute.xlu0 %1116 }
 0x302   :  { %861 = vperm.xlu1 %1644, %v687_v7  }
 0x305   :  { %v2244_v49 = vpop.permute.xlu0 %1120 }
 0x306   :  { %1645 = vset.pattern.permute.xlu1 %v1687_v1  ;;  %v842_v1 = vadd.f32 %v2211_v40, %v2130_v26  ;;  %v1127_v26 = vadd.f32 %v2124_v34, %v1117_v2 }
 0x307   :  { %959 = vperm.xlu1 %1645, %v687_v7  }
 0x30b   :  { %1646 = vset.pattern.permute.xlu1 %v1692_v23 }
 0x30c   :  { %1143 = vperm.xlu1 %1646, %v687_v7  }
 0x310   :  { %1649 = vset.pattern.permute.xlu1 %v1689_v14  ;;  %v2249_v14 = vld [vmem:[%s2511_s7] ss:$0 sm:$0xff]  ;;  %s1694_s7 = smov 126  }
 0x311   :  { %1043 = vperm.xlu1 %1649, %v685_v61   ;;  %v945_v61 = vadd.f32 %v2128_v42, %v2234_v24  ;;  %v1037_v24 = vadd.f32 %v2128_v42, %v2238_v45 }
 0x35a   :  { %v857_v46 = vpop.permute.xlu1 %856 }
 0x35b   :  { %v866_v29 = vmul.f32 %v857_v46, %v842_v1 }
 0x35d   :  { %v876_v38 = vadd.f32 %v2249_v14, %v866_v29 }
 0x35e   :  { %v1040_v33 = vpop.permute.xlu0 %1039 }
 0x35f   :  { %891 = vrot.lane.b32.xlu0 %v876_v38, %s1693_s29  ;;  %v956_v32 = vpop.permute.xlu1 %955  ;;  %881 = vst.msk [vmem:[#allocation2 + $0x30] sm:$0xff] %vm878_vm14, %v876_v38  ;;  %v1054_v4 = vmul.f32 %v1040_v33, %v1034_v52  ;;  %v2391_v33 = vld [vmem:[%s2513_s10 + $0x8] sm:$0xff] }
 0x360   :  { %v964_v6 = vmul.f32 %v956_v32, %v944_v3  ;;  %v2396_v32 = vld [vmem:[%s2513_s10 + $0x10] sm:$0xff] }
 0x361   :  { %v2316_v23 = vadd.f32 %v2249_v14, %v1054_v4 }
 0x362   :  { %v2257_v22 = vadd.f32 %v2249_v14, %v964_v6  ;;  %v2259_v39 = vpop.permute.xlu0 %1051  ;;  %v2401_v6 = vld [vmem:[%s2513_s10 + $0x18] sm:$0xff] }
 0x363   :  { %907 = vrot.lane.b32.xlu0 %v876_v38, %s1694_s7  ;;  %v1057_v1 = vmul.f32 %v2259_v39, %v1037_v24  ;;  %v1129_v38 = vadd.f32 %v2128_v42, %v2244_v49  ;;  %v2374_v42 = vld [vmem:[%s2512_s9] sm:$0xff]  ;;  %v2379_v49 = vld [vmem:[%s2512_s9 + $0x8] sm:$0xff] }
 0x364   :  { %978 = vrot.lane.b32.xlu1 %v2257_v22, %s1695_s30  ;;  %v1048_v13 = vpop.permute.xlu1 %1047 }
 0x365   :  { %v1056_v28 = vmul.f32 %v1048_v13, %v1036_v51  ;;  %v2340_v46 = vadd.f32 %v2249_v14, %v1057_v1  ;;  %v1214_v51 = vpack.c.bf16 %v2401_v6, %v2391_v33 }
 0x367   :  { %v852_v36 = vpop.permute.xlu0 %851  ;;  %v2270_v37 = vadd.f32 %v2249_v14, %v1056_v28 }
 0x368   :  { %v865_v16 = vmul.f32 %v852_v36, %v841_v27  ;;  %999 = vrot.lane.b32.xlu1 %v2257_v22, %s1693_s29 }
 0x369   :  { %v1140_v60 = vpop.permute.xlu1 %1139 }
 0x36a   :  { %v2273_v0 = vadd.f32 %v2249_v14, %v865_v16  ;;  %v1148_v54 = vmul.f32 %v1140_v60, %v1128_v55 }
 0x36c   :  { %v952_v35 = vpop.permute.xlu0 %951  ;;  %1070 = vrot.lane.b32.xlu1 %v2270_v37, %s1696_s12  ;;  %880 = vst.msk [vmem:[#allocation2 + $0x28] sm:$0xff] %vm878_vm14, %v2273_v0  ;;  %v1152_v48 = vadd.f32 %v2249_v14, %v1148_v54 }
 0x36d   :  { %v963_v53 = vmul.f32 %v952_v35, %v943_v19 }
 0x36e   :  { %v847_v40 = vpop.permute.xlu1 %846 }
 0x36f   :  { %v2284_v43 = vadd.f32 %v2249_v14, %v963_v53  ;;  %v864_v21 = vmul.f32 %v847_v40, %v840_v20 }
 0x370   :  { %1087 = vrot.lane.b32.xlu1 %v2270_v37, %s1695_s30 }
 0x371   :  { %v874_v25 = vadd.f32 %v2249_v14, %v864_v21  ;;  %v1136_v57 = vpop.permute.xlu0 %1135 }
 0x372   :  { %v1147_v15 = vmul.f32 %v1136_v57, %v1127_v26 }
 0x373   :  { %887 = vrot.lane.b32.xlu0 %v874_v25, %s1693_s29  ;;  %v948_v50 = vpop.permute.xlu1 %947  ;;  %879 = vst.msk [vmem:[#allocation2 + $0x20] sm:$0xff] %vm878_vm14, %v874_v25 }
 0x374   :  { %v2296_v9 = vadd.f32 %v2249_v14, %v1147_v15  ;;  %1162 = vrot.lane.b32.xlu1 %v1152_v48, %s1697_s13  ;;  %v962_v31 = vmul.f32 %v948_v50, %v942_v10 }
 0x376   :  { %v2302_v62 = vadd.f32 %v2249_v14, %v962_v31 }
 0x377   :  { %903 = vrot.lane.b32.xlu0 %v874_v25, %s1694_s7 }
 0x378   :  { %1179 = vrot.lane.b32.xlu1 %v1152_v48, %s1696_s12  ;;  %v1132_v30 = vpop.permute.xlu1 %1131 }
 0x379   :  { %v1146_v2 = vmul.f32 %v1132_v30, %v1126_v63 }
 0x37b   :  { %v1150_v44 = vadd.f32 %v2249_v14, %v1146_v2 }
 0x37c   :  { %974 = vrot.lane.b32.xlu1 %v2302_v62, %s1695_s30 }
 0x37d   :  { %v862_v12 = vpop.permute.xlu1 %861 }
 0x37e   :  { %v867_v7 = vmul.f32 %v862_v12, %v843_v59 }
 0x380   :  { %v877_v17 = vadd.f32 %v2249_v14, %v867_v7  ;;  %995 = vrot.lane.b32.xlu1 %v2302_v62, %s1693_s29 }
 0x382   :  { %v960_v18 = vpop.permute.xlu1 %959  ;;  %882 = vst.msk [vmem:[#allocation2 + $0x38] sm:$0xff] %vm878_vm14, %v877_v17 }
 0x383   :  { %v965_v11 = vmul.f32 %v960_v18, %v945_v61 }
 0x384   :  { %1066 = vrot.lane.b32.xlu1 %v2316_v23, %s1696_s12 }
 0x385   :  { %v2324_v41 = vadd.f32 %v2249_v14, %v965_v11 }
 0x387   :  { %980 = vrot.lane.b32.xlu0 %v2324_v41, %s1695_s30  ;;  %v1144_v47 = vpop.permute.xlu1 %1143 }
 0x388   :  { %1083 = vrot.lane.b32.xlu1 %v2316_v23, %s1695_s30  ;;  %v1149_v34 = vmul.f32 %v1144_v47, %v1129_v38 }
 0x38a   :  { %v1153_v58 = vadd.f32 %v2249_v14, %v1149_v34 }
 0x38b   :  { %1001 = vrot.lane.b32.xlu0 %v2324_v41, %s1693_s29 }
 0x38c   :  { %1158 = vrot.lane.b32.xlu1 %v1150_v44, %s1697_s13  ;;  %v1044_v45 = vpop.permute.xlu1 %1043 }
 0x38d   :  { %v1055_v29 = vmul.f32 %v1044_v45, %v1035_v56 }
 0x38f   :  { %v2345_v3 = vadd.f32 %v2249_v14, %v1055_v29  ;;  %1072 = vrot.lane.b32.xlu0 %v2340_v46, %s1696_s12  ;;  %v2384_v14 = vld [vmem:[%s2513_s10] sm:$0xff]  ;;  %s2464_s10 = smov 0  }
 0x390   :  { %1175 = vrot.lane.b32.xlu1 %v1150_v44, %s1696_s12  ;;  %v1213_v39 = vpack.c.bf16 %v2396_v32, %v2384_v14 }
 0x393   :  { %1089 = vrot.lane.b32.xlu0 %v2340_v46, %s1695_s30 }
 0x394   :  { %1191 = vrot.lane.b32.xlu1 %v1150_v44, %s1695_s30 }
 0x397   :  { %1164 = vrot.lane.b32.xlu0 %v1153_v58, %s1697_s13 }
 0x398   :  { %893 = vrot.lane.b32.xlu1 %v877_v17, %s1693_s29 }
 0x39b   :  { %1181 = vrot.lane.b32.xlu0 %v1153_v58, %s1696_s12 }
 0x39c   :  { %909 = vrot.lane.b32.xlu1 %v877_v17, %s1694_s7 }
 0x39f   :  { %976 = vrot.lane.b32.xlu0 %v2284_v43, %s1695_s30 }
 0x3a0   :  { %889 = vrot.lane.b32.xlu1 %v2273_v0, %s1693_s29 }
 0x3a3   :  { %997 = vrot.lane.b32.xlu0 %v2284_v43, %s1693_s29 }
 0x3a4   :  { %905 = vrot.lane.b32.xlu1 %v2273_v0, %s1694_s7 }
 0x3a7   :  { %1068 = vrot.lane.b32.xlu0 %v2345_v3, %s1696_s12 }
 0x3a8   :  { %1195 = vrot.lane.b32.xlu1 %v1152_v48, %s1695_s30 }
 0x3ab   :  { %1085 = vrot.lane.b32.xlu0 %v2345_v3, %s1695_s30 }
 0x3af   :  { %1160 = vrot.lane.b32.xlu0 %v2296_v9, %s1697_s13 }
 0x3b3   :  { %1177 = vrot.lane.b32.xlu0 %v2296_v9, %s1696_s12 }
 0x3b7   :  { %1193 = vrot.lane.b32.xlu0 %v2296_v9, %s1695_s30 }
 0x3bb   :  { %1197 = vrot.lane.b32.xlu0 %v1153_v58, %s1695_s30 }
 0x3d1   :  { %v892_v13 = vpop.permute.xlu0 %891 }
 0x3d2   :  { %901 = vst.msk [vmem:[#allocation2 + $0x50] sm:$0xff] %vm878_vm14, %v892_v13 }
 0x3d3   :  { %993 = vst.msk [vmem:[#allocation2 + $0x50] sm:$0xff] %vm986_vm15, %v2257_v22 }
 0x3d5   :  { %v908_v27 = vpop.permute.xlu0 %907 }
 0x3d6   :  { %917 = vst.msk [vmem:[#allocation2 + $0x70] sm:$0xff] %vm878_vm14, %v908_v27  ;;  %v979_v28 = vpop.permute.xlu1 %978 }
 0x3d7   :  { %989 = vst.msk [vmem:[#allocation2 + $0x30] sm:$0xff] %vm986_vm15, %v979_v28 }
 0x3da   :  { %v1000_v36 = vpop.permute.xlu1 %999 }
 0x3db   :  { %1009 = vst.msk [vmem:[#allocation2 + $0x70] sm:$0xff] %vm986_vm15, %v1000_v36 }
 0x3dc   :  { %1101 = vst.msk [vmem:[#allocation2 + $0x70] sm:$0xff] %vm1078_vm0, %v2270_v37 }
 0x3de   :  { %v1071_v16 = vpop.permute.xlu1 %1070 }
 0x3df   :  { %1081 = vst.msk [vmem:[#allocation2 + $0x30] sm:$0xff] %vm1078_vm0, %v1071_v16 }
 0x3e2   :  { %v1088_v60 = vpop.permute.xlu1 %1087 }
 0x3e3   :  { %1097 = vst.msk [vmem:[#allocation2 + $0x50] sm:$0xff] %vm1078_vm0, %v1088_v60 }
 0x3e5   :  { %v888_v22 = vpop.permute.xlu0 %887 }
 0x3e6   :  { %899 = vst.msk [vmem:[#allocation2 + $0x40] sm:$0xff] %vm878_vm14, %v888_v22  ;;  %v1163_v0 = vpop.permute.xlu1 %1162 }
 0x3e7   :  { %991 = vst.msk [vmem:[#allocation2 + $0x40] sm:$0xff] %vm986_vm15, %v2302_v62 }
 0x3e8   :  { %1173 = vst.msk [vmem:[#allocation2 + $0x30] sm:$0xff] %vm1170_vm1, %v1163_v0 }
 0x3e9   :  { %v904_v19 = vpop.permute.xlu0 %903 }
 0x3ea   :  { %915 = vst.msk [vmem:[#allocation2 + $0x60] sm:$0xff] %vm878_vm14, %v904_v19  ;;  %v1180_v37 = vpop.permute.xlu1 %1179 }
 0x3eb   :  { %1189 = vst.msk [vmem:[#allocation2 + $0x50] sm:$0xff] %vm1170_vm1, %v1180_v37 }
 0x3ee   :  { %v975_v55 = vpop.permute.xlu1 %974 }
 0x3ef   :  { %987 = vst.msk [vmem:[#allocation2 + $0x20] sm:$0xff] %vm986_vm15, %v975_v55 }
 0x3f2   :  { %v996_v35 = vpop.permute.xlu1 %995 }
 0x3f3   :  { %1007 = vst.msk [vmem:[#allocation2 + $0x60] sm:$0xff] %vm986_vm15, %v996_v35 }
 0x3f4   :  { %1099 = vst.msk [vmem:[#allocation2 + $0x60] sm:$0xff] %vm1078_vm0, %v2316_v23 }
 0x3f6   :  { %v1067_v20 = vpop.permute.xlu1 %1066 }
 0x3f7   :  { %1079 = vst.msk [vmem:[#allocation2 + $0x20] sm:$0xff] %vm1078_vm0, %v1067_v20 }
 0x3f9   :  { %v981_v53 = vpop.permute.xlu0 %980 }
 0x3fa   :  { %990 = vst.msk [vmem:[#allocation2 + $0x38] sm:$0xff] %vm986_vm15, %v981_v53  ;;  %v1084_v54 = vpop.permute.xlu1 %1083 }
 0x3fb   :  { %1095 = vst.msk [vmem:[#allocation2 + $0x40] sm:$0xff] %vm1078_vm0, %v1084_v54 }
 0x3fd   :  { %v1002_v40 = vpop.permute.xlu0 %1001 }
 0x3fe   :  { %v1159_v21 = vpop.permute.xlu1 %1158 }
 0x3ff   :  { %1171 = vst.msk [vmem:[#allocation2 + $0x20] sm:$0xff] %vm1170_vm1, %v1159_v21 }
 0x401   :  { %v1073_v26 = vpop.permute.xlu0 %1072 }
 0x402   :  { %1082 = vst.msk [vmem:[#allocation2 + $0x38] sm:$0xff] %vm1078_vm0, %v1073_v26  ;;  %v1176_v25 = vpop.permute.xlu1 %1175 }
 0x403   :  { %1187 = vst.msk [vmem:[#allocation2 + $0x40] sm:$0xff] %vm1170_vm1, %v1176_v25 }
 0x405   :  { %v1090_v57 = vpop.permute.xlu0 %1089 }
 0x406   :  { %v1192_v48 = vpop.permute.xlu1 %1191 }
 0x407   :  { %1203 = vst.msk [vmem:[#allocation2 + $0x60] sm:$0xff] %vm1170_vm1, %v1192_v48 }
 0x409   :  { %v1165_v15 = vpop.permute.xlu0 %1164 }
 0x40a   :  { %1174 = vst.msk [vmem:[#allocation2 + $0x38] sm:$0xff] %vm1170_vm1, %v1165_v15  ;;  %v894_v50 = vpop.permute.xlu1 %893 }
 0x40b   :  { %902 = vst.msk [vmem:[#allocation2 + $0x58] sm:$0xff] %vm878_vm14, %v894_v50 }
 0x40c   :  { %994 = vst.msk [vmem:[#allocation2 + $0x58] sm:$0xff] %vm986_vm15, %v2324_v41 }
 0x40d   :  { %1098 = vst.msk [vmem:[#allocation2 + $0x58] sm:$0xff] %vm1078_vm0, %v1090_v57  ;;  %v1182_v10 = vpop.permute.xlu0 %1181 }
 0x40e   :  { %1190 = vst.msk [vmem:[#allocation2 + $0x58] sm:$0xff] %vm1170_vm1, %v1182_v10  ;;  %v910_v9 = vpop.permute.xlu1 %909 }
 0x40f   :  { %918 = vst.msk [vmem:[#allocation2 + $0x78] sm:$0xff] %vm878_vm14, %v910_v9 }
 0x410   :  { %1010 = vst.msk [vmem:[#allocation2 + $0x78] sm:$0xff] %vm986_vm15, %v1002_v40 }
 0x411   :  { %1102 = vst.msk [vmem:[#allocation2 + $0x78] sm:$0xff] %vm1078_vm0, %v2340_v46  ;;  %v977_v31 = vpop.permute.xlu0 %976 }
 0x412   :  { %988 = vst.msk [vmem:[#allocation2 + $0x28] sm:$0xff] %vm986_vm15, %v977_v31  ;;  %v890_v30 = vpop.permute.xlu1 %889 }
 0x413   :  { %900 = vst.msk [vmem:[#allocation2 + $0x48] sm:$0xff] %vm878_vm14, %v890_v30 }
 0x414   :  { %992 = vst.msk [vmem:[#allocation2 + $0x48] sm:$0xff] %vm986_vm15, %v2284_v43 }
 0x415   :  { %v998_v62 = vpop.permute.xlu0 %997 }
 0x416   :  { %v906_v59 = vpop.permute.xlu1 %905 }
 0x417   :  { %916 = vst.msk [vmem:[#allocation2 + $0x68] sm:$0xff] %vm878_vm14, %v906_v59 }
 0x418   :  { %1008 = vst.msk [vmem:[#allocation2 + $0x68] sm:$0xff] %vm986_vm15, %v998_v62 }
 0x419   :  { %1100 = vst.msk [vmem:[#allocation2 + $0x68] sm:$0xff] %vm1078_vm0, %v2345_v3  ;;  %v1069_v52 = vpop.permute.xlu0 %1068 }
 0x41a   :  { %1080 = vst.msk [vmem:[#allocation2 + $0x28] sm:$0xff] %vm1078_vm0, %v1069_v52  ;;  %v1196_v12 = vpop.permute.xlu1 %1195 }
 0x41b   :  { %1205 = vst.msk [vmem:[#allocation2 + $0x70] sm:$0xff] %vm1170_vm1, %v1196_v12 }
 0x41d   :  { %v1086_v4 = vpop.permute.xlu0 %1085 }
 0x41e   :  { %1096 = vst.msk [vmem:[#allocation2 + $0x48] sm:$0xff] %vm1078_vm0, %v1086_v4 }
 0x421   :  { %v1161_v7 = vpop.permute.xlu0 %1160 }
 0x422   :  { %1172 = vst.msk [vmem:[#allocation2 + $0x28] sm:$0xff] %vm1170_vm1, %v1161_v7 }
 0x425   :  { %v1178_v43 = vpop.permute.xlu0 %1177 }
 0x426   :  { %1188 = vst.msk [vmem:[#allocation2 + $0x48] sm:$0xff] %vm1170_vm1, %v1178_v43 }
 0x429   :  { %v1194_v17 = vpop.permute.xlu0 %1193 }
 0x42a   :  { %1204 = vst.msk [vmem:[#allocation2 + $0x68] sm:$0xff] %vm1170_vm1, %v1194_v17 }
 0x42d   :  { %v1198_v61 = vpop.permute.xlu0 %1197 }
 0x42e   :  { %1206 = vst.msk [vmem:[#allocation2 + $0x78] sm:$0xff] %vm1170_vm1, %v1198_v61 }
 0x42f LB: > { %1603 = vmatprep.mubr.msk.f32.mxu0 %vm639_vm13, %v2374_v42  ;;  %1336 = vmatprep.subr.bf16.mxu1 %v1214_v51  ;;  %s1515_s20 = sshll.u32 %s1685_s10, 4  ;;  %v1698_v11 = vmov 0   ;;  %vm1318_vm2 = vcmask 130048   ;;  %s1451_s5 = sshra.s32 %s1685_s10, 3  ;;  %s1685_s10 = sphi %s2464_s10, %s1225_s10  }
 0x430   : > { %1337 = vmatpush1.bf16.msra.mxu1 %v1213_v39  ;;  %s1227_s4 = scalar_lea.vmem [#allocation2], %s1515_s20  ;;  %1354 = vmatprep.mubr.bf16.mxu1 %v1698_v11  ;;  %v2520_v11 = vcvt.s32.f32 %v1778_v8  ;;  %s1454_s21 = sand.u32 7, %s1685_s10 }
 0x431   : > { %s1523_s22 = sshll.u32 %s1451_s5, 4  ;;  %s1225_s10 = sadd.s32 1, %s1685_s10  }
 0x432   : > { %s1457_s23 = sadd.s32 %s1523_s22, %s1454_s21  ;;  %p1222_p0 = scmp.ge.s32.totalorder %s1225_s10, 8  }
 0x433   : > { %s1458_s26 = scalar_lea.vmem %s2503_s11, %s1457_s23 }
 0x435   : > { %v1229_v23 = vld [vmem:[%s1227_s4 + $0x8] sm:$0xff]  ;;  %v1228_v18 = vld [vmem:[%s1227_s4] sm:$0xff] }
 0x436   : > { %1599 = vmatprep.subr.msk.mxu0 %vm639_vm13, %v1229_v23 }
 0x437   : > { %1600 = vmatpush3.xpose.msk.msra.mxu0 %vm639_vm13, %v1229_v23  ;;  %v2519_v23 = vcvt.s32.f32 %v1769_v5 }
 0x438   : > { %1601 = vmatprep.subr.msk.mxu0 %vm639_vm13, %v1228_v18 }
 0x43b   : > { %1602 = vmatpush3.xpose.msk.msra.mxu0 %vm639_vm13, %v1228_v18 }
 0x43e   : > { %1604 = vmatmul.mubr.msk.f32.vlgmr.msra.gmra.mxu0 %vm639_vm13, %v2379_v49 }
 0x4fe   : > { %v1605_v63 = vpop.f32.mrf.mxu0 }
 0x500   : > { %v1308_v41 = vpop.f32.mrf.mxu0 }
 0x501   : > { %v1317_v2 = vpack.c.bf16 %v1605_v63, %v1308_v41 }
 0x503   : > { %1520 = vmatmul.mubr.msk.bf16.vlgmr.msra.gmra.mxu1 %vm1318_vm2, %v1317_v2 }
 0x5c3   : > { %v1356_v24 = vpop.f32.mrf.mxu1 }
 0x5c5   : > { %v1358_v47 = vpop.f32.mrf.mxu1 }
 0x5c7   : > { %v1360_v1 = vpop.f32.mrf.mxu1 }
 0x5c8   : > { %v1365_v44 = vmax.f32 %v1356_v24, %v1360_v1 }
 0x5c9   : > { %v1362_v56 = vpop.f32.mrf.mxu1 }
 0x5ca   : > { %v1366_v45 = vrot.slane %v1365_v44, 4  ;;  %v1372_v46 = vmax.f32 %v1358_v47, %v1362_v56 }
 0x5cc   : > { %v1367_v29 = vmax.f32 %v1365_v44, %v1366_v45  ;;  %v1373_v38 = vrot.slane %v1372_v46, 4  ;;  %v2522_v44 = vmov %v2520_v11 }
 0x5ce   : > { %v1368_v3 = vrot.slane %v1367_v29, 2  ;;  %v1374_v34 = vmax.f32 %v1372_v46, %v1373_v38 }
 0x5d0   : > { %v1369_v58 = vmax.f32 %v1367_v29, %v1368_v3  ;;  %v1375_v13 = vrot.slane %v1374_v34, 2 }
 0x5d2   : > { %v1370_v27 = vrot.slane %v1369_v58, 1  ;;  %v1376_v28 = vmax.f32 %v1374_v34, %v1375_v13 }
 0x5d4   : > { %v1371_v36 = vmax.f32 %v1369_v58, %v1370_v27  ;;  %v1377_v16 = vrot.slane %v1376_v28, 1  ;;  %v1699_v58 = vmov 1966171168  }
 0x5d5   : > { %v1433_v13 = vunpack.c.l.s4 %v1699_v58 }
 0x5d6   : > { %v1379_v60 = vsub.f32 %v1356_v24, %v1371_v36  ;;  %v1381_v22 = vsub.f32 %v1360_v1, %v1371_v36  ;;  %v1378_v0 = vmax.f32 %v1376_v28, %v1377_v16 }
 0x5d8   : > { %v1383_v19 = vmul.f32 1.442695, %v1379_v60  ;;  %v1387_v37 = vmul.f32 1.442695, %v1381_v22  ;;  %v1380_v55 = vsub.f32 %v1358_v47, %v1378_v0  ;;  %v1382_v35 = vsub.f32 %v1362_v56, %v1378_v0 }
 0x5d9   : > { %v2521_v47 = vmov %v2519_v23  ;;  %v1434_v60 = vunpack.c.0.s8 %v1433_v13 }
 0x5da   : > { %1667 = vpow2.f32 %v1383_v19  ;;  %v1385_v20 = vmul.f32 1.442695, %v1380_v55  ;;  %v1389_v53 = vmul.f32 1.442695, %v1382_v35 }
 0x5db   : > { %1669 = vpow2.f32 %v1387_v37  ;;  %v1437_v37 = vsub.s32 %v1434_v60, %v1769_v5 }
 0x5dc   : > { %1671 = vpow2.f32 %v1385_v20  ;;  %v2523_v20 = vlaneseq }
 0x5dd   : > { %1673 = vpow2.f32 %v1389_v53 }
 0x5de   : > { %vm1449_vm3 = vcmp.lt.s32.totalorder %v2523_v20, 256 }
 0x5e7   : > { %v1668_v54 = vpop.eup %1667 }
 0x5e8   : > { %v1670_v40 = vpop.eup %1669 }
 0x5e9   : > { %v1672_v21 = vpop.eup %1671  ;;  %v1391_v26 = vadd.f32 %v1670_v40, %v1668_v54 }
 0x5ea   : > { %v1674_v25 = vpop.eup %1673 }
 0x5eb   : > { %v1392_v57 = vrot.slane %v1391_v26, 4  ;;  %v1398_v48 = vadd.f32 %v1674_v25, %v1672_v21 }
 0x5ed   : > { %v1393_v15 = vadd.f32 %v1392_v57, %v1391_v26  ;;  %v1399_v50 = vrot.slane %v1398_v48, 4 }
 0x5ef   : > { %v1394_v10 = vrot.slane %v1393_v15, 2  ;;  %v1400_v9 = vadd.f32 %v1399_v50, %v1398_v48 }
 0x5f1   : > { %v1395_v31 = vadd.f32 %v1394_v10, %v1393_v15  ;;  %v1401_v30 = vrot.slane %v1400_v9, 2 }
 0x5f3   : > { %v1396_v62 = vrot.slane %v1395_v31, 1  ;;  %v1402_v59 = vadd.f32 %v1401_v30, %v1400_v9 }
 0x5f5   : > { %v1397_v52 = vadd.f32 %v1396_v62, %v1395_v31  ;;  %v1403_v12 = vrot.slane %v1402_v59, 1 }
 0x5f7   : > { %1675 = vrcp.f32 %v1397_v52  ;;  %v1404_v4 = vadd.f32 %v1403_v12, %v1402_v59 }
 0x5f9   : > { %1677 = vrcp.f32 %v1404_v4 }
 0x604   : > { %v1676_v7 = vpop.eup %1675 }
 0x605   : > { %v1407_v43 = vmul.f32 %v1676_v7, %v1668_v54  ;;  %v1409_v17 = vmul.f32 %v1676_v7, %v1670_v40 }
 0x606   : > { %v1678_v61 = vpop.eup %1677 }
 0x607   : > { %v1411_v18 = vmul.f32 %v1407_v43, %v2519_v23  ;;  %v1413_v63 = vmul.f32 %v1409_v17, %v2520_v11  ;;  %v1408_v41 = vmul.f32 %v1678_v61, %v1672_v21  ;;  %v1410_v2 = vmul.f32 %v1678_v61, %v1674_v25 }
 0x609   : > { %v1415_v24 = vadd.f32 %v1413_v63, %v1411_v18  ;;  %v1412_v1 = vmul.f32 %v1408_v41, %v2521_v47  ;;  %v1414_v56 = vmul.f32 %v1410_v2, %v2522_v44 }
 0x60b   : > { %v1416_v45 = vrot.slane %v1415_v24, 4  ;;  %v1422_v46 = vadd.f32 %v1414_v56, %v1412_v1 }
 0x60d   : > { %v1417_v29 = vadd.f32 %v1416_v45, %v1415_v24  ;;  %v1423_v38 = vrot.slane %v1422_v46, 4 }
 0x60f   : > { %v1418_v3 = vrot.slane %v1417_v29, 2  ;;  %v1424_v34 = vadd.f32 %v1423_v38, %v1422_v46 }
 0x611   : > { %v1419_v27 = vadd.f32 %v1418_v3, %v1417_v29  ;;  %v1425_v28 = vrot.slane %v1424_v34, 2 }
 0x613   : > { %v1420_v36 = vrot.slane %v1419_v27, 1  ;;  %v1426_v16 = vadd.f32 %v1425_v28, %v1424_v34 }
 0x615   : > { %v1427_v22 = vrot.slane %v1426_v16, 1  ;;  %v1421_v0 = vadd.f32 %v1420_v36, %v1419_v27 }
 0x617   : > { %v1428_v19 = vadd.f32 %v1427_v22, %v1426_v16 }
 0x619   : > { %v1431_v55 = vcombine.low %v1421_v0, %v1428_v19 }
 0x61b   : > { %v1438_v35 = vrot.slane %v1431_v55, %v1437_v37  ;;  %1224 = sbr.rel (!%p1222_p0) target bundleno = 1071 (0x42f), region = 73 }
 0x61d   : > { %v1445_v53 = vrot.slane %v1438_v35, %v1437_v37 }
 0x61f   : > { %1459 = vst.msk [vmem:[%s1458_s26] ss:$8 sm:$0x3] %vm1449_vm3, %v1445_v53 }

</bundles_post_ra>
